<compile_context>
chip_gen: v7x
topology: tpu7x:2x2x1
jax: 0.10.0
libtpu: 0.0.40
codegen_flags: <defaults>
</compile_context>

<pallas_src>
import functools

import jax
import jax.numpy as jnp
import numpy as np
from jax import lax
from jax.experimental import pallas as pl
from jax.experimental.pallas import tpu as pltpu


# ----------------------------------------------------------------------------
# Pallas kernel: one (batch, row-block) tile of the bottleneck block per step.
# ----------------------------------------------------------------------------
def _bottleneck_kernel(x_ref, halo_ref, w1_ref, b1_ref, w2_ref, b2_ref,
                       w3_ref, b3_ref, o_ref, pad_ref):
    TH = x_ref.shape[1]          # rows in this block
    W = x_ref.shape[2]           # image width
    Cp = x_ref.shape[3]          # padded in/out channels (multiple of 128)
    Wd = w1_ref.shape[1]         # padded bottleneck width (multiple of 128)

    r = pl.program_id(1)
    R = pl.num_programs(1)

    x = x_ref[0]                 # (TH, W, Cp)  f32
    halo = halo_ref[0]           # (2,  W, Cp)  f32  [row above, row below]

    # ---- conv1 (1x1, BN scale folded into w1) + bias + ReLU  (bf16 MXU) ----
    x2d = x.reshape(TH * W, Cp)
    h1_main = jnp.dot(x2d.astype(jnp.bfloat16), w1_ref[...],
                      preferred_element_type=jnp.float32)
    h1_main = jnp.maximum(h1_main + b1_ref[...], 0.0)            # (TH*W, Wd)

    h1_halo = jnp.dot(halo.reshape(2 * W, Cp).astype(jnp.bfloat16), w1_ref[...],
                      preferred_element_type=jnp.float32)
    h1_halo = jnp.maximum(h1_halo + b1_ref[...], 0.0)            # (2*W, Wd)

    # ---- stage h1 in the padded VMEM scratch (border cols kept at zero) ----
    zcol = jnp.zeros((TH + 2, 1, Wd), jnp.float32)
    pad_ref[:, 0:1, :] = zcol
    pad_ref[:, W + 1:W + 2, :] = zcol
    pad_ref[1:TH + 1, 1:W + 1, :] = h1_main.reshape(TH, W, Wd)
    pad_ref[0:1, 1:W + 1, :] = h1_halo[:W].reshape(1, W, Wd)
    pad_ref[TH + 1:TH + 2, 1:W + 1, :] = h1_halo[W:].reshape(1, W, Wd)

    # Halo rows at the image top/bottom came in as zero *input* rows; after
    # conv1+bias+ReLU they are relu(b1) != 0, so force true zero padding there.
    zrow = jnp.zeros((1, W + 2, Wd), jnp.float32)

    @pl.when(r == 0)
    def _():
        pad_ref[0:1, :, :] = zrow

    @pl.when(r == R - 1)
    def _():
        pad_ref[TH + 1:TH + 2, :, :] = zrow

    # ---- conv2: 3x3 pad=1 as three matmuls with K = 3*Wd (im2col over kw) ---
    h2 = None
    for dh in range(3):
        taps = [pad_ref[dh:dh + TH, dw:dw + W, :]
                .reshape(TH * W, Wd).astype(jnp.bfloat16) for dw in range(3)]
        patch = jnp.concatenate(taps, axis=-1)                   # (TH*W, 3*Wd)
        part = jnp.dot(patch, w2_ref[dh],                        # (3*Wd, Wd)
                       preferred_element_type=jnp.float32)
        h2 = part if h2 is None else h2 + part
    h2 = jnp.maximum(h2 + b2_ref[...], 0.0)                      # (TH*W, Wd)

    # ---- conv3 (1x1) + bias + residual + ReLU ------------------------------
    h3 = jnp.dot(h2.astype(jnp.bfloat16), w3_ref[...],
                 preferred_element_type=jnp.float32)
    h3 = h3 + b3_ref[...]                                        # (TH*W, Cp)
    out = jnp.maximum(h3 + x2d, 0.0)                             # residual in f32
    o_ref[0] = out.reshape(TH, W, Cp).astype(o_ref.dtype)


# ----------------------------------------------------------------------------
# Wrapper: layout plumbing (NCHW->NHWC, BN folding, channel padding, halos).
# ----------------------------------------------------------------------------
def _round_up(x, m):
    return ((x + m - 1) // m) * m


def _pick_row_block(H, target=32):
    if H <= target:
        return H
    for th in range(target, 0, -1):
        if H % th == 0:
            return th
    return H


def bottleneck_forward(x_nchw, params, row_block=None, lane_multiple=128):
    """x_nchw: [N, C, H, W] float32. Returns [N, C, H, W]."""
    (w1, s1, b1, w2, s2, b2, w3, s3, b3) = params
    N, Cin, H, W = x_nchw.shape
    width = w1.shape[1]
    Cout = w3.shape[1]
    assert Cout == Cin, "residual add requires inplanes == planes*expansion"

    TH = row_block if row_block is not None else _pick_row_block(H)
    assert H % TH == 0, "row_block must divide H"
    R = H // TH

    Cp = _round_up(Cin, lane_multiple)      # padded in/out channels
    Wd = _round_up(width, lane_multiple)    # padded bottleneck width

    f32, bf16 = jnp.float32, jnp.bfloat16

    # Fold BN scales into conv weights, zero-pad channels, cast to bf16.
    w1f = jnp.zeros((Cp, Wd), f32).at[:Cin, :width].set(w1 * s1)
    w2f = jnp.zeros((3, 3, Wd, Wd), f32).at[:, :, :width, :width].set(w2 * s2)
    w2f = w2f.reshape(3, 3 * Wd, Wd)        # (kh, kw*in, out): K = 3*Wd per kh
    w3f = jnp.zeros((Wd, Cp), f32).at[:width, :Cout].set(w3 * s3)
    w1f, w2f, w3f = w1f.astype(bf16), w2f.astype(bf16), w3f.astype(bf16)

    b1p = jnp.zeros((1, Wd), f32).at[:, :width].set(b1)
    b2p = jnp.zeros((1, Wd), f32).at[:, :width].set(b2)
    b3p = jnp.zeros((1, Cp), f32).at[:, :Cout].set(b3)

    # NHWC + channel padding (f32 kept for the residual add).
    x_nhwc = jnp.transpose(x_nchw, (0, 2, 3, 1)).astype(f32)
    x_p = jnp.zeros((N, H, W, Cp), f32).at[..., :Cin].set(x_nhwc)

    # Per-row-block halo rows (row above / below each block; zero at borders).
    zrow = jnp.zeros((N, 1, W, Cp), f32)
    if R > 1:
        above = jnp.concatenate([zrow, x_p[:, TH - 1:H - TH:TH]], axis=1)
        below = jnp.concatenate([x_p[:, TH:H:TH], zrow], axis=1)
    else:
        above, below = zrow, zrow
    halo = jnp.stack([above, below], axis=2).reshape(N, 2 * R, W, Cp)

    zero2 = lambda n, r: (0, 0)
    grid_spec = pltpu.PrefetchScalarGridSpec(
        num_scalar_prefetch=0,
        grid=(N, R),
        in_specs=[
            pl.BlockSpec((1, TH, W, Cp), lambda n, r: (n, r, 0, 0)),     # x
            pl.BlockSpec((1, 2, W, Cp), lambda n, r: (n, r, 0, 0)),      # halo
            pl.BlockSpec((Cp, Wd), zero2),                               # w1
            pl.BlockSpec((1, Wd), zero2),                                # b1
            pl.BlockSpec((3, 3 * Wd, Wd), lambda n, r: (0, 0, 0)),       # w2
            pl.BlockSpec((1, Wd), zero2),                                # b2
            pl.BlockSpec((Wd, Cp), zero2),                               # w3
            pl.BlockSpec((1, Cp), zero2),                                # b3
        ],
        out_specs=pl.BlockSpec((1, TH, W, Cp), lambda n, r: (n, r, 0, 0)),
        scratch_shapes=[pltpu.VMEM((TH + 2, W + 2, Wd), jnp.float32)],
    )

    out_p = pl.pallas_call(
        _bottleneck_kernel,
        out_shape=jax.ShapeDtypeStruct((N, H, W, Cp), f32),
        grid_spec=grid_spec,
        compiler_params=pltpu.CompilerParams(
            dimension_semantics=("parallel", "parallel"),
            vmem_limit_bytes=48 * 1024 * 1024,
        ),
    )(x_p, halo, w1f, b1p, w2f, b2p, w3f, b3p)

    out = out_p[..., :Cout]
    return jnp.transpose(out, (0, 3, 1, 2))                      # back to NCHW


# ----------------------------------------------------------------------------
# Deterministic parameter init (inference-mode BN -> per-channel scale/bias).
# ----------------------------------------------------------------------------
def make_params(key, inplanes, planes, base_width=64, groups=1, eps=1e-5):
    width = int(planes * (base_width / 64.0)) * groups
    cout = planes * 4  # expansion = 4
    ks = jax.random.split(key, 15)

    def bn_fold(kg, kb, km, kv, c):
        gamma = 1.0 + 0.1 * jax.random.normal(kg, (c,), jnp.float32)
        beta = 0.1 * jax.random.normal(kb, (c,), jnp.float32)
        rmean = 0.1 * jax.random.normal(km, (c,), jnp.float32)
        rvar = jnp.abs(1.0 + 0.1 * jax.random.normal(kv, (c,), jnp.float32))
        scale = gamma / jnp.sqrt(rvar + eps)
        bias = beta - rmean * scale
        return scale.reshape(1, c), bias.reshape(1, c)

    # conv weights stored as [in, out] / [kh, kw, in, out] (NHWC matmul form)
    w1 = 0.1 * jax.random.normal(ks[0], (inplanes, width), jnp.float32)
    w2 = 0.1 * jax.random.normal(ks[1], (3, 3, width, width), jnp.float32)
    w3 = 0.1 * jax.random.normal(ks[2], (width, cout), jnp.float32)

    s1, b1 = bn_fold(ks[3], ks[4], ks[5], ks[6], width)
    s2, b2 = bn_fold(ks[7], ks[8], ks[9], ks[10], width)
    s3, b3 = bn_fold(ks[11], ks[12], ks[13], ks[14], cout)
    return (w1, s1, b1, w2, s2, b2, w3, s3, b3)


# ----------------------------------------------------------------------------
# Pure-JAX reference (lax.conv), mirroring the kernel's bf16-operand /
# f32-accumulation precision so the comparison is tight.
# ----------------------------------------------------------------------------
def reference_forward(x_nchw, params):
    (w1, s1, b1, w2, s2, b2, w3, s3, b3) = params
    bf16 = jnp.bfloat16
    x = jnp.transpose(x_nchw, (0, 2, 3, 1)).astype(jnp.float32)  # NHWC
    dn = ("NHWC", "HWIO", "NHWC")

    w1f = (w1 * s1).astype(bf16)
    w2f = (w2 * s2).astype(bf16)
    w3f = (w3 * s3).astype(bf16)

    h = lax.conv_general_dilated(x.astype(bf16), w1f[None, None], (1, 1),
                                 "VALID", dimension_numbers=dn,
                                 preferred_element_type=jnp.float32)
    h = jnp.maximum(h + b1[0], 0.0)
    h = lax.conv_general_dilated(h.astype(bf16), w2f, (1, 1),
                                 ((1, 1), (1, 1)), dimension_numbers=dn,
                                 preferred_element_type=jnp.float32)
    h = jnp.maximum(h + b2[0], 0.0)
    h = lax.conv_general_dilated(h.astype(bf16), w3f[None, None], (1, 1),
                                 "VALID", dimension_numbers=dn,
                                 preferred_element_type=jnp.float32)
    h = h + b3[0]
    out = jnp.maximum(h + x, 0.0)
    return jnp.transpose(out, (0, 3, 1, 2))


if __name__ == "__main__":
    # Small shapes consistent with the module: inplanes = planes * expansion.
    N, inplanes, planes, H, W = 2, 32, 8, 16, 16

    key = jax.random.PRNGKey(0)
    kx, kp = jax.random.split(key)
    x = jax.random.normal(kx, (N, inplanes, H, W), jnp.float32)
    params = make_params(kp, inplanes, planes)

    # row_block=8 -> 2 row blocks per image: exercises the halo / border path.
    fwd = jax.jit(functools.partial(bottleneck_forward, row_block=8))
    out = jax.block_until_ready(fwd(x, params))

    ref = reference_forward(x, params)
    np.testing.assert_allclose(np.asarray(out), np.asarray(ref),
                               rtol=1e-2, atol=1e-2)

    print("KERNEL_OK")
</pallas_src>

<mosaic_0001>
module attributes {stable_mosaic.version = 11 : i64} {
  func.func @_bottleneck_kernel(%arg0: i32, %arg1: i32, %arg2: memref<1x8x16x128xf32, #tpu.memory_space<vmem>>, %arg3: memref<1x2x16x128xf32, #tpu.memory_space<vmem>>, %arg4: memref<128x128xbf16, #tpu.memory_space<vmem>>, %arg5: memref<1x128xf32, #tpu.memory_space<vmem>>, %arg6: memref<3x384x128xbf16, #tpu.memory_space<vmem>>, %arg7: memref<1x128xf32, #tpu.memory_space<vmem>>, %arg8: memref<128x128xbf16, #tpu.memory_space<vmem>>, %arg9: memref<1x128xf32, #tpu.memory_space<vmem>>, %arg10: memref<1x8x16x128xf32, #tpu.memory_space<vmem>>, %arg11: memref<10x18x128xf32, #tpu.memory_space<vmem>>) attributes {dimension_semantics = [#tpu.dimension_semantics<parallel>, #tpu.dimension_semantics<parallel>], iteration_bounds = array<i64: 2, 2>, scalar_prefetch = 0 : i64, scratch_operands = 1 : i64, tpu.core_type = #tpu.core_type<tc>, window_params = [{transform_indices = @transform_0, window_bounds = array<i64: 1, 8, 16, 128>}, {transform_indices = @transform_1, window_bounds = array<i64: 1, 2, 16, 128>}, {pipeline_mode = #tpu.pipeline_mode<synchronous>, transform_indices = @transform_2, window_bounds = array<i64: 128, 128>}, {pipeline_mode = #tpu.pipeline_mode<synchronous>, transform_indices = @transform_3, window_bounds = array<i64: 1, 128>}, {pipeline_mode = #tpu.pipeline_mode<synchronous>, transform_indices = @transform_4, window_bounds = array<i64: 3, 384, 128>}, {pipeline_mode = #tpu.pipeline_mode<synchronous>, transform_indices = @transform_5, window_bounds = array<i64: 1, 128>}, {pipeline_mode = #tpu.pipeline_mode<synchronous>, transform_indices = @transform_6, window_bounds = array<i64: 128, 128>}, {pipeline_mode = #tpu.pipeline_mode<synchronous>, transform_indices = @transform_7, window_bounds = array<i64: 1, 128>}, {transform_indices = @transform_8, window_bounds = array<i64: 1, 8, 16, 128>}]} {
    %c0 = arith.constant 0 : index
    %c0_0 = arith.constant 0 : index
    %c0_1 = arith.constant 0 : index
    %c0_2 = arith.constant 0 : index
    %0 = vector.load %arg2[%c0, %c0_0, %c0_1, %c0_2] : memref<1x8x16x128xf32, #tpu.memory_space<vmem>>, vector<1x8x16x128xf32>
    %1 = vector.shape_cast %0 : vector<1x8x16x128xf32> to vector<8x16x128xf32>
    %c0_3 = arith.constant 0 : index
    %c0_4 = arith.constant 0 : index
    %c0_5 = arith.constant 0 : index
    %c0_6 = arith.constant 0 : index
    %2 = vector.load %arg3[%c0_3, %c0_4, %c0_5, %c0_6] : memref<1x2x16x128xf32, #tpu.memory_space<vmem>>, vector<1x2x16x128xf32>
    %3 = vector.shape_cast %2 : vector<1x2x16x128xf32> to vector<2x16x128xf32>
    %4 = vector.shape_cast %1 : vector<8x16x128xf32> to vector<128x128xf32>
    %5 = arith.truncf %4 : vector<128x128xf32> to vector<128x128xbf16>
    %c0_7 = arith.constant 0 : index
    %c0_8 = arith.constant 0 : index
    %6 = vector.load %arg4[%c0_7, %c0_8] : memref<128x128xbf16, #tpu.memory_space<vmem>>, vector<128x128xbf16>
    %cst = arith.constant dense<0.000000e+00> : vector<128x128xf32>
    %7 = tpu.matmul %5, %6, %cst {dimension_numbers = #tpu.dot_dimension_numbers<[1], [0], [0], [1], [0, 0, 1, 1], [], []>} : vector<128x128xbf16>, vector<128x128xbf16>, vector<128x128xf32> -> vector<128x128xf32>
    %c0_9 = arith.constant 0 : index
    %c0_10 = arith.constant 0 : index
    %8 = vector.load %arg5[%c0_9, %c0_10] : memref<1x128xf32, #tpu.memory_space<vmem>>, vector<1x128xf32>
    %9 = vector.broadcast %8 : vector<1x128xf32> to vector<128x128xf32>
    %10 = arith.addf %7, %9 : vector<128x128xf32>
    %cst_11 = arith.constant 0.000000e+00 : f32
    %11 = vector.broadcast %cst_11 : f32 to vector<128x128xf32>
    %12 = arith.maximumf %10, %11 : vector<128x128xf32>
    %13 = vector.shape_cast %3 : vector<2x16x128xf32> to vector<32x128xf32>
    %14 = arith.truncf %13 : vector<32x128xf32> to vector<32x128xbf16>
    %c0_12 = arith.constant 0 : index
    %c0_13 = arith.constant 0 : index
    %15 = vector.load %arg4[%c0_12, %c0_13] : memref<128x128xbf16, #tpu.memory_space<vmem>>, vector<128x128xbf16>
    %cst_14 = arith.constant dense<0.000000e+00> : vector<32x128xf32>
    %16 = tpu.matmul %14, %15, %cst_14 {dimension_numbers = #tpu.dot_dimension_numbers<[1], [0], [0], [1], [0, 0, 1, 1], [], []>} : vector<32x128xbf16>, vector<128x128xbf16>, vector<32x128xf32> -> vector<32x128xf32>
    %c0_15 = arith.constant 0 : index
    %c0_16 = arith.constant 0 : index
    %17 = vector.load %arg5[%c0_15, %c0_16] : memref<1x128xf32, #tpu.memory_space<vmem>>, vector<1x128xf32>
    %18 = vector.broadcast %17 : vector<1x128xf32> to vector<32x128xf32>
    %19 = arith.addf %16, %18 : vector<32x128xf32>
    %cst_17 = arith.constant 0.000000e+00 : f32
    %20 = vector.broadcast %cst_17 : f32 to vector<32x128xf32>
    %21 = arith.maximumf %19, %20 : vector<32x128xf32>
    %cst_18 = arith.constant 0.000000e+00 : f32
    %22 = vector.broadcast %cst_18 : f32 to vector<10x1x128xf32>
    %c0_19 = arith.constant 0 : index
    %c0_20 = arith.constant 0 : index
    %c0_21 = arith.constant 0 : index
    %23 = vector.load %arg11[%c0_19, %c0_20, %c0_21] : memref<10x18x128xf32, #tpu.memory_space<vmem>>, vector<10x1x128xf32>
    tpu.vector_store %arg11[%c0_19, %c0_20, %c0_21], %22 {strides = array<i32>} : memref<10x18x128xf32, #tpu.memory_space<vmem>>, vector<10x1x128xf32>,
    %c0_22 = arith.constant 0 : index
    %c17 = arith.constant 17 : index
    %c0_23 = arith.constant 0 : index
    %24 = vector.load %arg11[%c0_22, %c17, %c0_23] : memref<10x18x128xf32, #tpu.memory_space<vmem>>, vector<10x1x128xf32>
    tpu.vector_store %arg11[%c0_22, %c17, %c0_23], %22 {strides = array<i32>} : memref<10x18x128xf32, #tpu.memory_space<vmem>>, vector<10x1x128xf32>,
    %25 = vector.shape_cast %12 : vector<128x128xf32> to vector<8x16x128xf32>
    %c1 = arith.constant 1 : index
    %c1_24 = arith.constant 1 : index
    %c0_25 = arith.constant 0 : index
    %26 = vector.load %arg11[%c1, %c1_24, %c0_25] : memref<10x18x128xf32, #tpu.memory_space<vmem>>, vector<8x16x128xf32>
    tpu.vector_store %arg11[%c1, %c1_24, %c0_25], %25 {strides = array<i32>} : memref<10x18x128xf32, #tpu.memory_space<vmem>>, vector<8x16x128xf32>,
    %27 = vector.extract_strided_slice %21 {offsets = [0, 0], sizes = [16, 128], strides = [1, 1]} : vector<32x128xf32> to vector<16x128xf32>
    %28 = vector.shape_cast %27 : vector<16x128xf32> to vector<1x16x128xf32>
    %c0_26 = arith.constant 0 : index
    %c1_27 = arith.constant 1 : index
    %c0_28 = arith.constant 0 : index
    %29 = vector.load %arg11[%c0_26, %c1_27, %c0_28] : memref<10x18x128xf32, #tpu.memory_space<vmem>>, vector<1x16x128xf32>
    tpu.vector_store %arg11[%c0_26, %c1_27, %c0_28], %28 {strides = array<i32>} : memref<10x18x128xf32, #tpu.memory_space<vmem>>, vector<1x16x128xf32>,
    %30 = vector.extract_strided_slice %21 {offsets = [16, 0], sizes = [16, 128], strides = [1, 1]} : vector<32x128xf32> to vector<16x128xf32>
    %31 = vector.shape_cast %30 : vector<16x128xf32> to vector<1x16x128xf32>
    %c9 = arith.constant 9 : index
    %c1_29 = arith.constant 1 : index
    %c0_30 = arith.constant 0 : index
    %32 = vector.load %arg11[%c9, %c1_29, %c0_30] : memref<10x18x128xf32, #tpu.memory_space<vmem>>, vector<1x16x128xf32>
    tpu.vector_store %arg11[%c9, %c1_29, %c0_30], %31 {strides = array<i32>} : memref<10x18x128xf32, #tpu.memory_space<vmem>>, vector<1x16x128xf32>,
    %cst_31 = arith.constant 0.000000e+00 : f32
    %33 = vector.broadcast %cst_31 : f32 to vector<1x18x128xf32>
    %c0_i32 = arith.constant 0 : i32
    %34 = arith.cmpi eq, %arg1, %c0_i32 : i32
    %35 = arith.extui %34 : i1 to i32
    %c0_i32_32 = arith.constant 0 : i32
    %36 = arith.cmpi ne, %35, %c0_i32_32 : i32
    scf.if %36 {
      %c0_85 = arith.constant 0 : index
      %c0_86 = arith.constant 0 : index
      %c0_87 = arith.constant 0 : index
      %99 = vector.load %arg11[%c0_85, %c0_86, %c0_87] : memref<10x18x128xf32, #tpu.memory_space<vmem>>, vector<1x18x128xf32>
      tpu.vector_store %arg11[%c0_85, %c0_86, %c0_87], %33 {strides = array<i32>} : memref<10x18x128xf32, #tpu.memory_space<vmem>>, vector<1x18x128xf32>,
    } else {
    }
    %c1_i32 = arith.constant 1 : i32
    %37 = arith.cmpi eq, %arg1, %c1_i32 : i32
    %38 = arith.extui %37 : i1 to i32
    %c0_i32_33 = arith.constant 0 : i32
    %39 = arith.cmpi ne, %38, %c0_i32_33 : i32
    scf.if %39 {
      %c9_85 = arith.constant 9 : index
      %c0_86 = arith.constant 0 : index
      %c0_87 = arith.constant 0 : index
      %99 = vector.load %arg11[%c9_85, %c0_86, %c0_87] : memref<10x18x128xf32, #tpu.memory_space<vmem>>, vector<1x18x128xf32>
      tpu.vector_store %arg11[%c9_85, %c0_86, %c0_87], %33 {strides = array<i32>} : memref<10x18x128xf32, #tpu.memory_space<vmem>>, vector<1x18x128xf32>,
    } else {
    }
    %c0_34 = arith.constant 0 : index
    %c0_35 = arith.constant 0 : index
    %c0_36 = arith.constant 0 : index
    %40 = vector.load %arg11[%c0_34, %c0_35, %c0_36] : memref<10x18x128xf32, #tpu.memory_space<vmem>>, vector<8x16x128xf32>
    %41 = vector.shape_cast %40 : vector<8x16x128xf32> to vector<128x128xf32>
    %42 = arith.truncf %41 : vector<128x128xf32> to vector<128x128xbf16>
    %c0_37 = arith.constant 0 : index
    %c1_38 = arith.constant 1 : index
    %c0_39 = arith.constant 0 : index
    %43 = vector.load %arg11[%c0_37, %c1_38, %c0_39] : memref<10x18x128xf32, #tpu.memory_space<vmem>>, vector<8x16x128xf32>
    %44 = vector.shape_cast %43 : vector<8x16x128xf32> to vector<128x128xf32>
    %45 = arith.truncf %44 : vector<128x128xf32> to vector<128x128xbf16>
    %c0_40 = arith.constant 0 : index
    %c2 = arith.constant 2 : index
    %c0_41 = arith.constant 0 : index
    %46 = vector.load %arg11[%c0_40, %c2, %c0_41] : memref<10x18x128xf32, #tpu.memory_space<vmem>>, vector<8x16x128xf32>
    %47 = vector.shape_cast %46 : vector<8x16x128xf32> to vector<128x128xf32>
    %48 = arith.truncf %47 : vector<128x128xf32> to vector<128x128xbf16>
    %49 = tpu.concatenate %42, %45, %48 in 1 : vector<128x128xbf16>, vector<128x128xbf16>, vector<128x128xbf16> -> vector<128x384xbf16>
    %c0_42 = arith.constant 0 : index
    %c0_43 = arith.constant 0 : index
    %c0_44 = arith.constant 0 : index
    %50 = vector.load %arg6[%c0_42, %c0_43, %c0_44] : memref<3x384x128xbf16, #tpu.memory_space<vmem>>, vector<1x384x128xbf16>
    %51 = vector.shape_cast %50 : vector<1x384x128xbf16> to vector<384x128xbf16>
    %cst_45 = arith.constant dense<0.000000e+00> : vector<128x128xf32>
    %52 = tpu.matmul %49, %51, %cst_45 {dimension_numbers = #tpu.dot_dimension_numbers<[1], [0], [0], [1], [0, 0, 1, 1], [], []>} : vector<128x384xbf16>, vector<384x128xbf16>, vector<128x128xf32> -> vector<128x128xf32>
    %c1_46 = arith.constant 1 : index
    %c0_47 = arith.constant 0 : index
    %c0_48 = arith.constant 0 : index
    %53 = vector.load %arg11[%c1_46, %c0_47, %c0_48] : memref<10x18x128xf32, #tpu.memory_space<vmem>>, vector<8x16x128xf32>
    %54 = vector.shape_cast %53 : vector<8x16x128xf32> to vector<128x128xf32>
    %55 = arith.truncf %54 : vector<128x128xf32> to vector<128x128xbf16>
    %c1_49 = arith.constant 1 : index
    %c1_50 = arith.constant 1 : index
    %c0_51 = arith.constant 0 : index
    %56 = vector.load %arg11[%c1_49, %c1_50, %c0_51] : memref<10x18x128xf32, #tpu.memory_space<vmem>>, vector<8x16x128xf32>
    %57 = vector.shape_cast %56 : vector<8x16x128xf32> to vector<128x128xf32>
    %58 = arith.truncf %57 : vector<128x128xf32> to vector<128x128xbf16>
    %c1_52 = arith.constant 1 : index
    %c2_53 = arith.constant 2 : index
    %c0_54 = arith.constant 0 : index
    %59 = vector.load %arg11[%c1_52, %c2_53, %c0_54] : memref<10x18x128xf32, #tpu.memory_space<vmem>>, vector<8x16x128xf32>
    %60 = vector.shape_cast %59 : vector<8x16x128xf32> to vector<128x128xf32>
    %61 = arith.truncf %60 : vector<128x128xf32> to vector<128x128xbf16>
    %62 = tpu.concatenate %55, %58, %61 in 1 : vector<128x128xbf16>, vector<128x128xbf16>, vector<128x128xbf16> -> vector<128x384xbf16>
    %c1_55 = arith.constant 1 : index
    %c0_56 = arith.constant 0 : index
    %c0_57 = arith.constant 0 : index
    %63 = vector.load %arg6[%c1_55, %c0_56, %c0_57] : memref<3x384x128xbf16, #tpu.memory_space<vmem>>, vector<1x384x128xbf16>
    %64 = vector.shape_cast %63 : vector<1x384x128xbf16> to vector<384x128xbf16>
    %cst_58 = arith.constant dense<0.000000e+00> : vector<128x128xf32>
    %65 = tpu.matmul %62, %64, %cst_58 {dimension_numbers = #tpu.dot_dimension_numbers<[1], [0], [0], [1], [0, 0, 1, 1], [], []>} : vector<128x384xbf16>, vector<384x128xbf16>, vector<128x128xf32> -> vector<128x128xf32>
    %66 = arith.addf %52, %65 : vector<128x128xf32>
    %c2_59 = arith.constant 2 : index
    %c0_60 = arith.constant 0 : index
    %c0_61 = arith.constant 0 : index
    %67 = vector.load %arg11[%c2_59, %c0_60, %c0_61] : memref<10x18x128xf32, #tpu.memory_space<vmem>>, vector<8x16x128xf32>
    %68 = vector.shape_cast %67 : vector<8x16x128xf32> to vector<128x128xf32>
    %69 = arith.truncf %68 : vector<128x128xf32> to vector<128x128xbf16>
    %c2_62 = arith.constant 2 : index
    %c1_63 = arith.constant 1 : index
    %c0_64 = arith.constant 0 : index
    %70 = vector.load %arg11[%c2_62, %c1_63, %c0_64] : memref<10x18x128xf32, #tpu.memory_space<vmem>>, vector<8x16x128xf32>
    %71 = vector.shape_cast %70 : vector<8x16x128xf32> to vector<128x128xf32>
    %72 = arith.truncf %71 : vector<128x128xf32> to vector<128x128xbf16>
    %c2_65 = arith.constant 2 : index
    %c2_66 = arith.constant 2 : index
    %c0_67 = arith.constant 0 : index
    %73 = vector.load %arg11[%c2_65, %c2_66, %c0_67] : memref<10x18x128xf32, #tpu.memory_space<vmem>>, vector<8x16x128xf32>
    %74 = vector.shape_cast %73 : vector<8x16x128xf32> to vector<128x128xf32>
    %75 = arith.truncf %74 : vector<128x128xf32> to vector<128x128xbf16>
    %76 = tpu.concatenate %69, %72, %75 in 1 : vector<128x128xbf16>, vector<128x128xbf16>, vector<128x128xbf16> -> vector<128x384xbf16>
    %c2_68 = arith.constant 2 : index
    %c0_69 = arith.constant 0 : index
    %c0_70 = arith.constant 0 : index
    %77 = vector.load %arg6[%c2_68, %c0_69, %c0_70] : memref<3x384x128xbf16, #tpu.memory_space<vmem>>, vector<1x384x128xbf16>
    %78 = vector.shape_cast %77 : vector<1x384x128xbf16> to vector<384x128xbf16>
    %cst_71 = arith.constant dense<0.000000e+00> : vector<128x128xf32>
    %79 = tpu.matmul %76, %78, %cst_71 {dimension_numbers = #tpu.dot_dimension_numbers<[1], [0], [0], [1], [0, 0, 1, 1], [], []>} : vector<128x384xbf16>, vector<384x128xbf16>, vector<128x128xf32> -> vector<128x128xf32>
    %80 = arith.addf %66, %79 : vector<128x128xf32>
    %c0_72 = arith.constant 0 : index
    %c0_73 = arith.constant 0 : index
    %81 = vector.load %arg7[%c0_72, %c0_73] : memref<1x128xf32, #tpu.memory_space<vmem>>, vector<1x128xf32>
    %82 = vector.broadcast %81 : vector<1x128xf32> to vector<128x128xf32>
    %83 = arith.addf %80, %82 : vector<128x128xf32>
    %cst_74 = arith.constant 0.000000e+00 : f32
    %84 = vector.broadcast %cst_74 : f32 to vector<128x128xf32>
    %85 = arith.maximumf %83, %84 : vector<128x128xf32>
    %86 = arith.truncf %85 : vector<128x128xf32> to vector<128x128xbf16>
    %c0_75 = arith.constant 0 : index
    %c0_76 = arith.constant 0 : index
    %87 = vector.load %arg8[%c0_75, %c0_76] : memref<128x128xbf16, #tpu.memory_space<vmem>>, vector<128x128xbf16>
    %cst_77 = arith.constant dense<0.000000e+00> : vector<128x128xf32>
    %88 = tpu.matmul %86, %87, %cst_77 {dimension_numbers = #tpu.dot_dimension_numbers<[1], [0], [0], [1], [0, 0, 1, 1], [], []>} : vector<128x128xbf16>, vector<128x128xbf16>, vector<128x128xf32> -> vector<128x128xf32>
    %c0_78 = arith.constant 0 : index
    %c0_79 = arith.constant 0 : index
    %89 = vector.load %arg9[%c0_78, %c0_79] : memref<1x128xf32, #tpu.memory_space<vmem>>, vector<1x128xf32>
    %90 = vector.broadcast %89 : vector<1x128xf32> to vector<128x128xf32>
    %91 = arith.addf %88, %90 : vector<128x128xf32>
    %92 = arith.addf %91, %4 : vector<128x128xf32>
    %cst_80 = arith.constant 0.000000e+00 : f32
    %93 = vector.broadcast %cst_80 : f32 to vector<128x128xf32>
    %94 = arith.maximumf %92, %93 : vector<128x128xf32>
    %95 = vector.shape_cast %94 : vector<128x128xf32> to vector<8x16x128xf32>
    %c0_81 = arith.constant 0 : index
    %c0_82 = arith.constant 0 : index
    %c0_83 = arith.constant 0 : index
    %c0_84 = arith.constant 0 : index
    %96 = vector.load %arg10[%c0_81, %c0_82, %c0_83, %c0_84] : memref<1x8x16x128xf32, #tpu.memory_space<vmem>>, vector<1x8x16x128xf32>
    %97 = vector.shape_cast %96 : vector<1x8x16x128xf32> to vector<8x16x128xf32>
    %98 = vector.shape_cast %95 : vector<8x16x128xf32> to vector<1x8x16x128xf32>
    tpu.vector_store %arg10[%c0_81, %c0_82, %c0_83, %c0_84], %98 {strides = array<i32>} : memref<1x8x16x128xf32, #tpu.memory_space<vmem>>, vector<1x8x16x128xf32>,
    return
  }
  func.func @transform_0(%arg0: i32, %arg1: i32) -> (i32, i32, i32, i32) {
    %c0_i32 = arith.constant 0 : i32
    %c0_i32_0 = arith.constant 0 : i32
    %c0_i32_1 = arith.constant 0 : i32
    return %arg0, %arg1, %c0_i32, %c0_i32_0 : i32, i32, i32, i32
  }
  func.func @transform_1(%arg0: i32, %arg1: i32) -> (i32, i32, i32, i32) {
    %c0_i32 = arith.constant 0 : i32
    %c0_i32_0 = arith.constant 0 : i32
    %c0_i32_1 = arith.constant 0 : i32
    return %arg0, %arg1, %c0_i32, %c0_i32_0 : i32, i32, i32, i32
  }
  func.func @transform_2(%arg0: i32, %arg1: i32) -> (i32, i32) {
    %c0_i32 = arith.constant 0 : i32
    %c0_i32_0 = arith.constant 0 : i32
    %c0_i32_1 = arith.constant 0 : i32
    return %c0_i32, %c0_i32_0 : i32, i32
  }
  func.func @transform_3(%arg0: i32, %arg1: i32) -> (i32, i32) {
    %c0_i32 = arith.constant 0 : i32
    %c0_i32_0 = arith.constant 0 : i32
    %c0_i32_1 = arith.constant 0 : i32
    return %c0_i32, %c0_i32_0 : i32, i32
  }
  func.func @transform_4(%arg0: i32, %arg1: i32) -> (i32, i32, i32) {
    %c0_i32 = arith.constant 0 : i32
    %c0_i32_0 = arith.constant 0 : i32
    %c0_i32_1 = arith.constant 0 : i32
    %c0_i32_2 = arith.constant 0 : i32
    return %c0_i32, %c0_i32_0, %c0_i32_1 : i32, i32, i32
  }
  func.func @transform_5(%arg0: i32, %arg1: i32) -> (i32, i32) {
    %c0_i32 = arith.constant 0 : i32
    %c0_i32_0 = arith.constant 0 : i32
    %c0_i32_1 = arith.constant 0 : i32
    return %c0_i32, %c0_i32_0 : i32, i32
  }
  func.func @transform_6(%arg0: i32, %arg1: i32) -> (i32, i32) {
    %c0_i32 = arith.constant 0 : i32
    %c0_i32_0 = arith.constant 0 : i32
    %c0_i32_1 = arith.constant 0 : i32
    return %c0_i32, %c0_i32_0 : i32, i32
  }
  func.func @transform_7(%arg0: i32, %arg1: i32) -> (i32, i32) {
    %c0_i32 = arith.constant 0 : i32
    %c0_i32_0 = arith.constant 0 : i32
    %c0_i32_1 = arith.constant 0 : i32
    return %c0_i32, %c0_i32_0 : i32, i32
  }
  func.func @transform_8(%arg0: i32, %arg1: i32) -> (i32, i32, i32, i32) {
    %c0_i32 = arith.constant 0 : i32
    %c0_i32_0 = arith.constant 0 : i32
    %c0_i32_1 = arith.constant 0 : i32
    return %arg0, %arg1, %c0_i32, %c0_i32_0 : i32, i32, i32, i32
  }
}

</mosaic_0001>

<bundles_post_ra>
// kernel: bottleneck_forward.1
= control target key start
LH: loop header
LB: loop body
LE: loop exit
PB: predicated region body
PF: predicated region fallthrough
CT: control target
= control target key end

     0   :  { %s3458_s27 = smov 0   ;;  %s3460_s28 = smov 0   ;;  %s4114_s0 = inlined_call_operand.vmem [shape: f32[2,16,16,128], index: 0, kind: input, shape index: {}]   ;;  %s4115_s1 = inlined_call_operand.vmem [shape: f32[2,4,16,128], index: 1, kind: input, shape index: {}]   ;;  %s4116_s2 = inlined_call_operand.vmem [shape: bf16[128,128], index: 2, kind: input, shape index: {}]   ;;  %s4117_s3 = inlined_call_operand.vmem [shape: f32[1,128], index: 3, kind: input, shape index: {}]   ;;  %s4118_s4 = inlined_call_operand.vmem [shape: bf16[3,384,128], index: 4, kind: input, shape index: {}]   ;;  %s4119_s5 = inlined_call_operand.vmem [shape: f32[1,128], index: 5, kind: input, shape index: {}]   ;;  %s4120_s6 = inlined_call_operand.vmem [shape: bf16[128,128], index: 6, kind: input, shape index: {}]   ;;  %s4121_s7 = inlined_call_operand.vmem [shape: f32[1,128], index: 7, kind: input, shape index: {}]   ;;  %s4122_s8 = inlined_call_operand.vmem [shape: f32[2,16,16,128], index: 8, kind: output, shape index: {}]  }
   0x1   :  { %s3462_s29 = smov 0   ;;  %s3464_s30 = smov 0  }
   0x2   :  { %s3466_s9 = smov 0  }
   0x3 LB: > { %s27_s10 = sadd.s32 1, %s3400_s29  ;;  %s30_s11 = sadd.s32 1, %s3404_s30  ;;  %s3408_s9 = sphi %s3466_s9, %s18_s9   ;;  %s3404_s30 = sphi %s3464_s30, %s4126_s30   ;;  %s3400_s29 = sphi %s3462_s29, %s4125_s29   ;;  %s3396_s28 = sphi %s3460_s28, %s4124_s28   ;;  %s3392_s27 = sphi %s3458_s27, %s4123_s27  }
   0x4   : > { %p28_p0 = scmp.ge.s32.totalorder %s27_s10, 2  ;;  %p2493_p1 = scmp.ge.s32.totalorder %s3408_s9, 1 }
   0x5   : > { %p302_p2 = scmp.lt.s32.totalorder %s3408_s9, 5 }
   0x6   : > { %s4128_s10 = smov (%p28_p0, %s27_s10), 0  ;;  %s4130_s11 = smov (!%p28_p0, %s30_s11), %s3404_s30 }
   0x7   : > { %p303_p3 = pnand %p2493_p1, %p302_p2  ;;  %p32_p4 = scmp.ge.s32.totalorder %s4130_s11, 2 }
   0x8   : > { %v3282_v0 = vld [vmem:[%s4116_s2] sm:$0xff] (!%p303_p3)   ;;  %s2494_s14 = sshll.u32 (!%p303_p3), %s3392_s27, 3  ;;  %v3283_v1 = vld [vmem:[%s4116_s2 + $0x8] sm:$0xff] (!%p303_p3)   ;;  %p357_p5 = scmp.lt.s32.totalorder (!%p303_p3), %s3396_s28, 1  ;;  %v3284_v2 = vld [vmem:[%s4116_s2 + $0x10] sm:$0xff] (!%p303_p3)   ;;  %v3410_v38 = vmov (!%p303_p3), 0.0  }
   0x9   : > { %s4132_s11 = smov (%p32_p4, %s4130_s11), 0  ;;  %306 = sbr.rel (%p303_p3) target bundleno = 927 (0x39f), region = 52 }
   0xa   : > { %2979 = vmatprep.subr.bf16.mxu0 (!%p303_p3), %v3282_v0  ;;  %3011 = vmatprep.subr.bf16.mxu1 (!%p303_p3), %v3282_v0  ;;  %p359_p6 = scmp.lt.s32.totalorder (!%p303_p3), %s2494_s14, 15  ;;  %s2498_s22 = sshll.u32 (!%p303_p3), %s3392_s27, 1  ;;  %v3285_v3 = vld [vmem:[%s4116_s2 + $0x18] sm:$0xff] (!%p303_p3)   ;;  %v3286_v7 = vld [vmem:[%s4116_s2 + $0x20] sm:$0xff] (!%p303_p3)   ;;  %v3287_v8 = vld [vmem:[%s4116_s2 + $0x28] sm:$0xff] (!%p303_p3)  }
   0xb   : > { %2980 = vmatpush3.bf16.msra.mxu0 (!%p303_p3), %v3282_v0  ;;  %3012 = vmatpush3.bf16.msra.mxu1 (!%p303_p3), %v3282_v0  ;;  %p370_p7 = scmp.lt.s32.totalorder (!%p303_p3), %s2498_s22, 3  ;;  %v3288_v12 = vld [vmem:[%s4116_s2 + $0x30] sm:$0xff] (!%p303_p3)   ;;  %v3289_v13 = vld [vmem:[%s4116_s2 + $0x38] sm:$0xff] (!%p303_p3)   ;;  %657 = vst [vmem:[#allocation2] sm:$0x1] (!%p303_p3), %v3410_v38  ;;  %p2515_p8 = scmp.ne.s32.totalorder (!%p303_p3), %s3392_s27, 0 }
   0xc   : > { %2981 = vmatprep.subr.bf16.mxu0 (!%p303_p3), %v3283_v1  ;;  %3013 = vmatprep.subr.bf16.mxu1 (!%p303_p3), %v3283_v1  ;;  %658 = vst [vmem:[#allocation2 + $0x18] sm:$0x1] (!%p303_p3), %v3410_v38  ;;  %659 = vst [vmem:[#allocation2 + $0x30] sm:$0x1] (!%p303_p3), %v3410_v38  ;;  %v3600_v39 = vld [vmem:[%s4117_s3] ss:$0 sm:$0xff] (!%p303_p3) }
   0xd   : > { %660 = vst [vmem:[#allocation2 + $0x48] sm:$0x1] (!%p303_p3), %v3410_v38  ;;  %661 = vst [vmem:[#allocation2 + $0x60] sm:$0x1] (!%p303_p3), %v3410_v38 }
   0xe   : > { %662 = vst [vmem:[#allocation2 + $0x78] sm:$0x1] (!%p303_p3), %v3410_v38  ;;  %663 = vst [vmem:[#allocation2 + $0x90] sm:$0x1] (!%p303_p3), %v3410_v38 }
   0xf   : > { %2982 = vmatpush3.bf16.msra.mxu0 (!%p303_p3), %v3283_v1  ;;  %3014 = vmatpush3.bf16.msra.mxu1 (!%p303_p3), %v3283_v1  ;;  %664 = vst [vmem:[#allocation2 + $0xa8] sm:$0x1] (!%p303_p3), %v3410_v38  ;;  %665 = vst [vmem:[#allocation2 + $0xc0] sm:$0x1] (!%p303_p3), %v3410_v38 }
  0x10   : > { %s4134_s28 = smov (!%p357_p5, %s3396_s28), 1  ;;  %s4136_s14 = smov (!%p359_p6, %s2494_s14), 15  ;;  %2983 = vmatprep.subr.bf16.mxu0 %v3284_v2  ;;  %3015 = vmatprep.subr.bf16.mxu1 %v3284_v2  ;;  %666 = vst [vmem:[#allocation2 + $0xd8] sm:$0x1] %v3410_v38  ;;  %667 = vst [vmem:[#allocation2 + $0x11] sm:$0x1] %v3410_v38 }
  0x11   : > { %s2496_s19 = sshll.u32 %s4134_s28, 5  ;;  %s2495_s20 = sshll.u32 %s4136_s14, 1  ;;  %668 = vst [vmem:[#allocation2 + $0x29] sm:$0x1] %v3410_v38  ;;  %669 = vst [vmem:[#allocation2 + $0x41] sm:$0x1] %v3410_v38 }
  0x12   : > { %s363_s21 = sadd.s32 %s2496_s19, %s2495_s20  ;;  %s4138_s22 = smov (!%p370_p7, %s2498_s22), 3  ;;  %670 = vst [vmem:[#allocation2 + $0x59] sm:$0x1] %v3410_v38  ;;  %671 = vst [vmem:[#allocation2 + $0x71] sm:$0x1] %v3410_v38 }
  0x13   : > { %s2497_s25 = sshll.u32 %s363_s21, 3  ;;  %2984 = vmatpush3.bf16.msra.mxu0 %v3284_v2  ;;  %3016 = vmatpush3.bf16.msra.mxu1 %v3284_v2  ;;  %s2500_s17 = sshll.u32 %s4134_s28, 3  ;;  %672 = vst [vmem:[#allocation2 + $0x89] sm:$0x1] %v3410_v38  ;;  %673 = vst [vmem:[#allocation2 + $0xa1] sm:$0x1] %v3410_v38 }
  0x14   : > { %s3510_s13 = scalar_lea.vmem %s4114_s0, %s2497_s25  ;;  %s3515_s16 = scalar_lea.vmem %s4122_s8, %s2497_s25  ;;  %2985 = vmatprep.subr.bf16.mxu0 %v3285_v3  ;;  %3017 = vmatprep.subr.bf16.mxu1 %v3285_v3  ;;  %674 = vst [vmem:[#allocation2 + $0xb9] sm:$0x1] %v3410_v38  ;;  %675 = vst [vmem:[#allocation2 + $0xd1] sm:$0x1] %v3410_v38 }
  0x15   : > { %v3518_v4 = vld [vmem:[%s3510_s13] sm:$0xff]  ;;  %v3521_v5 = vld [vmem:[%s3510_s13 + $0x8] sm:$0xff]  ;;  %s2499_s20 = sshll.u32 %s4138_s22, 1  ;;  %v3542_v14 = vld [vmem:[%s3510_s13 + $0x10] sm:$0xff]  ;;  %676 = vst [vmem:[#allocation2 + $0xe9] sm:$0x1] %v3410_v38 }
  0x16   : > { %v410_v6 = vpack.c.bf16 %v3521_v5, %v3518_v4  ;;  %s374_s21 = sadd.s32 %s2500_s17, %s2499_s20  ;;  %v3545_v15 = vld [vmem:[%s3510_s13 + $0x18] sm:$0xff]  ;;  %v3548_v18 = vld [vmem:[%s3510_s13 + $0x20] sm:$0xff]  ;;  %v3551_v19 = vld [vmem:[%s3510_s13 + $0x28] sm:$0xff] }
  0x17   : > { %s2501_s23 = sshll.u32 %s374_s21, 3  ;;  %2986 = vmatpush3.bf16.msra.mxu0 %v3285_v3  ;;  %3018 = vmatpush3.bf16.msra.mxu1 %v3285_v3  ;;  %v411_v20 = vpack.c.bf16 %v3545_v15, %v3542_v14  ;;  %v412_v22 = vpack.c.bf16 %v3551_v19, %v3548_v18  ;;  %v3558_v23 = vld [vmem:[%s3510_s13 + $0x30] sm:$0xff]  ;;  %v3561_v24 = vld [vmem:[%s3510_s13 + $0x38] sm:$0xff]  ;;  %v3564_v25 = vld [vmem:[%s3510_s13 + $0x40] sm:$0xff] }
  0x18   : > { %2995 = vmatprep.mubr.bf16.mxu0 %v410_v6  ;;  %s376_s26 = scalar_lea.vmem %s4115_s1, %s2501_s23  ;;  %2987 = vmatprep.subr.bf16.mxu0 %v3286_v7  ;;  %v3567_v26 = vld [vmem:[%s3510_s13 + $0x48] sm:$0xff]  ;;  %v413_v27 = vpack.c.bf16 %v3561_v24, %v3558_v23  ;;  %v3574_v29 = vld [vmem:[%s3510_s13 + $0x50] sm:$0xff]  ;;  %v3577_v30 = vld [vmem:[%s3510_s13 + $0x58] sm:$0xff] }
  0x19   : > { %3019 = vmatprep.subr.bf16.mxu1 %v3286_v7  ;;  %v406_v9 = vld [vmem:[%s376_s26] sm:$0xff]  ;;  %v407_v10 = vld [vmem:[%s376_s26 + $0x8] sm:$0xff]  ;;  %v408_v16 = vld [vmem:[%s376_s26 + $0x10] sm:$0xff]  ;;  %v414_v28 = vpack.c.bf16 %v3567_v26, %v3564_v25  ;;  %v415_v33 = vpack.c.bf16 %v3577_v30, %v3574_v29 }
  0x1a   : > { %v602_v11 = vpack.c.bf16 %v407_v10, %v406_v9  ;;  %v409_v17 = vld [vmem:[%s376_s26 + $0x18] sm:$0xff]  ;;  %v3580_v31 = vld [vmem:[%s3510_s13 + $0x60] sm:$0xff]  ;;  %v3583_v32 = vld [vmem:[%s3510_s13 + $0x68] sm:$0xff] }
  0x1b   : > { %2988 = vmatpush3.bf16.msra.mxu0 %v3286_v7  ;;  %3020 = vmatpush3.bf16.msra.mxu1 %v3286_v7  ;;  %v603_v21 = vpack.c.bf16 %v409_v17, %v408_v16  ;;  %v416_v34 = vpack.c.bf16 %v3583_v32, %v3580_v31  ;;  %v3590_v35 = vld [vmem:[%s3510_s13 + $0x70] sm:$0xff]  ;;  %v3593_v36 = vld [vmem:[%s3510_s13 + $0x78] sm:$0xff] }
  0x1c   : > { %2989 = vmatprep.subr.bf16.mxu0 %v3287_v8  ;;  %3021 = vmatprep.subr.bf16.mxu1 %v3287_v8  ;;  %v417_v37 = vpack.c.bf16 %v3593_v36, %v3590_v35 }
  0x1d   : > { %3027 = vmatprep.mubr.bf16.mxu1 %v602_v11 }
  0x1f   : > { %2990 = vmatpush3.bf16.msra.mxu0 %v3287_v8  ;;  %3022 = vmatpush3.bf16.msra.mxu1 %v3287_v8 }
  0x20   : > { %2991 = vmatprep.subr.bf16.mxu0 %v3288_v12  ;;  %3023 = vmatprep.subr.bf16.mxu1 %v3288_v12 }
  0x23   : > { %2992 = vmatpush3.bf16.msra.mxu0 %v3288_v12  ;;  %3024 = vmatpush3.bf16.msra.mxu1 %v3288_v12 }
  0x24   : > { %2993 = vmatprep.subr.bf16.mxu0 %v3289_v13  ;;  %3025 = vmatprep.subr.bf16.mxu1 %v3289_v13 }
  0x27   : > { %2994 = vmatpush3.bf16.msra.mxu0 %v3289_v13  ;;  %3026 = vmatpush3.bf16.msra.mxu1 %v3289_v13 }
  0x2a   : > { %2996 = vmatmul.mubr.bf16.vlgmr.msra.gmra.mrb[0].mxu0 %v411_v20  ;;  %3028 = vmatmul.mubr.bf16.vlgmr.msra.gmra.mrb[0].mxu1 %v603_v21 }
  0x2b   : > { %2999 = vmatprep.mubr.bf16.mxu0 %v412_v22 }
  0x32   : > { %3000 = vmatmul.mubr.bf16.gmra.mrb[4].mxu0 %v413_v27 }
  0x33   : > { %3003 = vmatprep.mubr.bf16.mxu0 %v414_v28 }
  0x3a   : > { %3004 = vmatmul.mubr.bf16.gmra.mrb[8].mxu0 %v415_v33 }
  0x3b   : > { %3007 = vmatprep.mubr.bf16.mxu0 %v416_v34 }
  0x42   : > { %3008 = vmatmul.mubr.bf16.gmra.mrb[12].mxu0 %v417_v37 }
  0xfd   : > { %v2997_v40 = vpop.f32.mrb[0].mxu0  ;;  %v3029_v41 = vpop.f32.mrb[0].mxu1 }
  0xfe   : > { %v532_v42 = vadd.f32 %v2997_v40, %v3600_v39  ;;  %v523_v43 = vpop.f32.mrb[1].mxu0  ;;  %v647_v44 = vadd.f32 %v3029_v41, %v3600_v39  ;;  %v638_v45 = vpop.f32.mrb[1].mxu1 }
  0xff   : > { %v524_v46 = vadd.f32 %v3600_v39, %v523_v43  ;;  %v2998_v47 = vpop.f32.mrb[2].mxu0  ;;  %v639_v48 = vadd.f32 %v3600_v39, %v638_v45  ;;  %v3030_v49 = vpop.f32.mrb[2].mxu1 }
 0x100   : > { %v588_v50 = vmax.f32 %v532_v42, 0.0  ;;  %v535_v51 = vadd.f32 %v2998_v47, %v3600_v39  ;;  %v526_v52 = vpop.f32.mrb[3].mxu0  ;;  %v655_v53 = vmax.f32 %v647_v44, 0.0  ;;  %v650_v54 = vadd.f32 %v3030_v49, %v3600_v39  ;;  %v641_v55 = vpop.f32.mrb[3].mxu1 }
 0x101   : > { %v586_v56 = vmax.f32 %v524_v46, 0.0  ;;  %v527_v57 = vadd.f32 %v3600_v39, %v526_v52  ;;  %v653_v58 = vmax.f32 %v639_v48, 0.0  ;;  %v642_v59 = vadd.f32 %v3600_v39, %v641_v55 }
 0x102   : > { %680 = vst [vmem:[#allocation2 + $0x31] sm:$0xff] %v588_v50  ;;  %v589_v60 = vmax.f32 %v535_v51, 0.0  ;;  %697 = vst [vmem:[#allocation2 + $0xd9] sm:$0xff] %v655_v53  ;;  %v656_v61 = vmax.f32 %v650_v54, 0.0  ;;  %v3411_v53 = vmov (!%p2515_p8), 0.0  }
 0x103   : > { %678 = vst [vmem:[#allocation2 + $0x19] sm:$0xff] %v586_v56  ;;  %v587_v62 = vmax.f32 %v527_v57, 0.0  ;;  %694 = vst [vmem:[#allocation2 + $0x1] sm:$0xff] %v653_v58  ;;  %v654_v63 = vmax.f32 %v642_v59, 0.0 }
 0x104   : > { %681 = vst [vmem:[#allocation2 + $0x39] sm:$0xff] %v589_v60  ;;  %698 = vst [vmem:[#allocation2 + $0xe1] sm:$0xff] %v656_v61 }
 0x105   : > { %679 = vst [vmem:[#allocation2 + $0x21] sm:$0xff] %v587_v62  ;;  %v3001_v0 = vpop.f32.mrb[4].mxu0  ;;  %695 = vst [vmem:[#allocation2 + $0x9] sm:$0xff] %v654_v63 }
 0x106   : > { %v548_v1 = vadd.f32 %v3001_v0, %v3600_v39  ;;  %v539_v2 = vpop.f32.mrb[5].mxu0  ;;  %703 = vst [vmem:[#allocation2] sm:$0xff] (!%p2515_p8), %v3411_v53  ;;  %704 = vst [vmem:[#allocation2 + $0x8] sm:$0xff] (!%p2515_p8), %v3411_v53 }
 0x107   : > { %v540_v3 = vadd.f32 %v3600_v39, %v539_v2  ;;  %v3002_v6 = vpop.f32.mrb[6].mxu0  ;;  %705 = vst [vmem:[#allocation2 + $0x10] sm:$0x3] (!%p2515_p8), %v3411_v53 }
 0x108   : > { %v592_v7 = vmax.f32 %v548_v1, 0.0  ;;  %v551_v8 = vadd.f32 %v3002_v6, %v3600_v39  ;;  %v542_v9 = vpop.f32.mrb[7].mxu0 }
 0x109   : > { %v590_v10 = vmax.f32 %v540_v3, 0.0  ;;  %v543_v11 = vadd.f32 %v3600_v39, %v542_v9 }
 0x10a   : > { %684 = vst [vmem:[#allocation2 + $0x61] sm:$0xff] %v592_v7  ;;  %v593_v12 = vmax.f32 %v551_v8, 0.0 }
 0x10b   : > { %682 = vst [vmem:[#allocation2 + $0x49] sm:$0xff] %v590_v10  ;;  %v591_v13 = vmax.f32 %v543_v11, 0.0 }
 0x10c   : > { %685 = vst [vmem:[#allocation2 + $0x69] sm:$0xff] %v593_v12 }
 0x10d   : > { %683 = vst [vmem:[#allocation2 + $0x51] sm:$0xff] %v591_v13  ;;  %v3005_v16 = vpop.f32.mrb[8].mxu0 }
 0x10e   : > { %v564_v17 = vadd.f32 %v3005_v16, %v3600_v39  ;;  %v555_v20 = vpop.f32.mrb[9].mxu0 }
 0x10f   : > { %v556_v21 = vadd.f32 %v3600_v39, %v555_v20  ;;  %v3006_v22 = vpop.f32.mrb[10].mxu0 }
 0x110   : > { %v596_v27 = vmax.f32 %v564_v17, 0.0  ;;  %v567_v28 = vadd.f32 %v3006_v22, %v3600_v39  ;;  %v558_v33 = vpop.f32.mrb[11].mxu0 }
 0x111   : > { %v594_v34 = vmax.f32 %v556_v21, 0.0  ;;  %v559_v37 = vadd.f32 %v3600_v39, %v558_v33 }
 0x112   : > { %688 = vst [vmem:[#allocation2 + $0x91] sm:$0xff] %v596_v27  ;;  %v597_v38 = vmax.f32 %v567_v28, 0.0 }
 0x113   : > { %686 = vst [vmem:[#allocation2 + $0x79] sm:$0xff] %v594_v34  ;;  %v595_v40 = vmax.f32 %v559_v37, 0.0 }
 0x114   : > { %689 = vst [vmem:[#allocation2 + $0x99] sm:$0xff] %v597_v38 }
 0x115   : > { %687 = vst [vmem:[#allocation2 + $0x81] sm:$0xff] %v595_v40  ;;  %v3009_v41 = vpop.f32.mrb[12].mxu0 }
 0x116   : > { %v580_v42 = vadd.f32 %v3009_v41, %v3600_v39  ;;  %v571_v43 = vpop.f32.mrb[13].mxu0 }
 0x117   : > { %v572_v44 = vadd.f32 %v3600_v39, %v571_v43  ;;  %v3010_v45 = vpop.f32.mrb[14].mxu0  ;;  %702 = sbr.rel (%p2515_p8) target bundleno = 286 (0x11e), region = 56 }
 0x118   : > { %v600_v46 = vmax.f32 %v580_v42, 0.0  ;;  %v583_v47 = vadd.f32 %v3010_v45, %v3600_v39  ;;  %v574_v48 = vpop.f32.mrb[15].mxu0 }
 0x119   : > { %v598_v49 = vmax.f32 %v572_v44, 0.0  ;;  %v575_v50 = vadd.f32 %v3600_v39, %v574_v48 }
 0x11a   : > { %692 = vst [vmem:[#allocation2 + $0xc1] sm:$0xff] %v600_v46  ;;  %v601_v51 = vmax.f32 %v583_v47, 0.0 }
 0x11b   : > { %690 = vst [vmem:[#allocation2 + $0xa9] sm:$0xff] %v598_v49  ;;  %v599_v52 = vmax.f32 %v575_v50, 0.0 }
 0x11c   : > { %693 = vst [vmem:[#allocation2 + $0xc9] sm:$0xff] %v601_v51 }
 0x11d   : > { %691 = vst [vmem:[#allocation2 + $0xb1] sm:$0xff] %v599_v52 }
 0x11e PF: > { %p2516_p9 = scmp.ne.s32.totalorder %s3392_s27, 1 }
 0x11f   : > { %v3412_v54 = vmov (!%p2516_p9), 0.0  }
 0x120   : > { %709 = sbr.rel (%p2516_p9) target bundleno = 295 (0x127), region = 60  ;;  %710 = vst [vmem:[#allocation2 + $0xd8] sm:$0xff] (!%p2516_p9), %v3412_v54  ;;  %711 = vst [vmem:[#allocation2 + $0xe0] sm:$0xff] (!%p2516_p9), %v3412_v54 }
 0x121   : > { %712 = vst [vmem:[#allocation2 + $0xe8] sm:$0x3] (!%p2516_p9), %v3412_v54 }
 0x127 PF: > { %v3290_v39 = vld [vmem:[%s4118_s4 + $0x100] sm:$0xff]   ;;  %v3293_v57 = vld [vmem:[%s4118_s4 + $0x108] sm:$0xff]   ;;  %v3296_v60 = vld [vmem:[%s4118_s4 + $0x110] sm:$0xff]  }
 0x128   : > { %v3291_v55 = vld [vmem:[%s4118_s4 + $0x140] sm:$0xff]   ;;  %2723 = vmatprep.subr.bf16.mxu0 %v3290_v39  ;;  %v3294_v58 = vld [vmem:[%s4118_s4 + $0x148] sm:$0xff]   ;;  %v3297_v61 = vld [vmem:[%s4118_s4 + $0x150] sm:$0xff]  }
 0x129   : > { %v3292_v56 = vld [vmem:[%s4118_s4 + $0xc0] sm:$0xff]   ;;  %3031 = vmatprep.subr.bf16.mxu1 %v3291_v55  ;;  %v3295_v59 = vld [vmem:[%s4118_s4 + $0xc8] sm:$0xff]   ;;  %v3298_v62 = vld [vmem:[%s4118_s4 + $0xd0] sm:$0xff]  }
 0x12a   : > { %2724 = vmatpush3.bf16.msra.mxu0 %v3292_v56  ;;  %3032 = vmatpush3.bf16.msra.mxu1 %v3291_v55  ;;  %v3299_v63 = vld [vmem:[%s4118_s4 + $0x118] sm:$0xff]   ;;  %v3302_v2 = vld [vmem:[%s4118_s4 + $0x120] sm:$0xff]   ;;  %v3305_v7 = vld [vmem:[%s4118_s4 + $0x128] sm:$0xff]  }
 0x12b   : > { %2725 = vmatprep.subr.bf16.mxu0 %v3293_v57  ;;  %3033 = vmatprep.subr.bf16.mxu1 %v3294_v58  ;;  %v3300_v0 = vld [vmem:[%s4118_s4 + $0x158] sm:$0xff]   ;;  %v3303_v3 = vld [vmem:[%s4118_s4 + $0x160] sm:$0xff]   ;;  %v3306_v8 = vld [vmem:[%s4118_s4 + $0x168] sm:$0xff]  }
 0x12c   : > { %v3301_v1 = vld [vmem:[%s4118_s4 + $0xd8] sm:$0xff]   ;;  %v3304_v6 = vld [vmem:[%s4118_s4 + $0xe0] sm:$0xff]   ;;  %v3307_v9 = vld [vmem:[%s4118_s4 + $0xe8] sm:$0xff]  }
 0x12d   : > { %v3308_v10 = vld [vmem:[%s4118_s4 + $0x130] sm:$0xff]   ;;  %v857_v13 = vld [vmem:[#allocation2 + $0x19] sm:$0xff]  ;;  %v858_v16 = vld [vmem:[#allocation2 + $0x21] sm:$0xff] }
 0x12e   : > { %2726 = vmatpush3.bf16.msra.mxu0 %v3295_v59  ;;  %3034 = vmatpush3.bf16.msra.mxu1 %v3294_v58  ;;  %v3309_v11 = vld [vmem:[%s4118_s4 + $0x170] sm:$0xff]   ;;  %v881_v17 = vld [vmem:[#allocation2 + $0x1a] sm:$0xff]  ;;  %v3693_v22 = vpack.c.bf16 %v858_v16, %v857_v13  ;;  %v882_v27 = vld [vmem:[#allocation2 + $0x22] sm:$0xff] }
 0x12f   : > { %2727 = vmatprep.subr.bf16.mxu0 %v3296_v60  ;;  %3035 = vmatprep.subr.bf16.mxu1 %v3297_v61  ;;  %v3310_v12 = vld [vmem:[%s4118_s4 + $0xf0] sm:$0xff]   ;;  %v3311_v20 = vld [vmem:[%s4118_s4 + $0x138] sm:$0xff]   ;;  %v3698_v33 = vpack.c.bf16 %v882_v27, %v881_v17  ;;  %v834_v37 = vld [vmem:[#allocation2 + $0x20] sm:$0xff] }
 0x130   : > { %v3312_v21 = vld [vmem:[%s4118_s4 + $0x178] sm:$0xff]   ;;  %1130 = vmatprep.mubr.bf16.mxu0 %v3693_v22  ;;  %v3314_v41 = vld [vmem:[%s4118_s4 + $0x40] sm:$0xff]   ;;  %v885_v46 = vld [vmem:[#allocation2 + $0x4a] sm:$0xff] }
 0x131   : > { %v3313_v28 = vld [vmem:[%s4118_s4 + $0xf8] sm:$0xff]   ;;  %3047 = vmatprep.mubr.bf16.mxu1 %v3698_v33  ;;  %v3315_v48 = vld [vmem:[%s4118_s4] sm:$0xff]   ;;  %v3316_v50 = vld [vmem:[%s4118_s4 + $0x48] sm:$0xff]  }
 0x132   : > { %2728 = vmatpush3.bf16.msra.mxu0 %v3298_v62  ;;  %3036 = vmatpush3.bf16.msra.mxu1 %v3297_v61  ;;  %v833_v34 = vld [vmem:[#allocation2 + $0x18] sm:$0xff]  ;;  %v3317_v52 = vld [vmem:[%s4118_s4 + $0x8] sm:$0xff]   ;;  %v835_v53 = vld [vmem:[#allocation2 + $0x30] sm:$0xff] }
 0x133   : > { %2729 = vmatprep.subr.bf16.mxu0 %v3299_v63  ;;  %3037 = vmatprep.subr.bf16.mxu1 %v3300_v0  ;;  %v883_v38 = vld [vmem:[#allocation2 + $0x32] sm:$0xff]  ;;  %v884_v40 = vld [vmem:[#allocation2 + $0x3a] sm:$0xff]  ;;  %v3705_v43 = vpack.c.bf16 %v834_v37, %v833_v34  ;;  %v887_v39 = vld [vmem:[#allocation2 + $0x62] sm:$0xff] }
 0x134   : > { %v859_v42 = vld [vmem:[#allocation2 + $0x31] sm:$0xff]  ;;  %v3707_v44 = vpack.c.bf16 %v884_v40, %v883_v38  ;;  %v860_v45 = vld [vmem:[#allocation2 + $0x39] sm:$0xff]  ;;  %v861_v57 = vld [vmem:[#allocation2 + $0x49] sm:$0xff] }
 0x135   : > { %v886_v47 = vld [vmem:[#allocation2 + $0x52] sm:$0xff]  ;;  %v3712_v49 = vpack.c.bf16 %v860_v45, %v859_v42  ;;  %v888_v55 = vld [vmem:[#allocation2 + $0x6a] sm:$0xff]  ;;  %v889_v59 = vld [vmem:[#allocation2 + $0x7a] sm:$0xff] }
 0x136   : > { %2730 = vmatpush3.bf16.msra.mxu0 %v3301_v1  ;;  %3038 = vmatpush3.bf16.msra.mxu1 %v3300_v0  ;;  %v3717_v51 = vpack.c.bf16 %v886_v47, %v885_v46  ;;  %v836_v54 = vld [vmem:[#allocation2 + $0x38] sm:$0xff]  ;;  %v3318_v56 = vld [vmem:[%s4118_s4 + $0x50] sm:$0xff]   ;;  %v890_v60 = vld [vmem:[#allocation2 + $0x82] sm:$0xff]  ;;  %v3731_v62 = vpack.c.bf16 %v888_v55, %v887_v39 }
 0x137   : > { %2731 = vmatprep.subr.bf16.mxu0 %v3302_v2  ;;  %3039 = vmatprep.subr.bf16.mxu1 %v3303_v3  ;;  %v862_v58 = vld [vmem:[#allocation2 + $0x51] sm:$0xff]  ;;  %v3729_v61 = vpack.c.bf16 %v836_v54, %v835_v53  ;;  %v3741_v2 = vpack.c.bf16 %v890_v60, %v889_v59  ;;  %v3325_v37 = vld [vmem:[%s4118_s4 + $0x28] sm:$0xff]   ;;  %v839_v38 = vld [vmem:[#allocation2 + $0x60] sm:$0xff] }
 0x138   : > { %v3319_v63 = vld [vmem:[%s4118_s4 + $0x10] sm:$0xff]   ;;  %v3736_v0 = vpack.c.bf16 %v862_v58, %v861_v57  ;;  %v3320_v1 = vld [vmem:[%s4118_s4 + $0x58] sm:$0xff]   ;;  %v840_v40 = vld [vmem:[#allocation2 + $0x68] sm:$0xff] }
 0x139   : > { %v893_v13 = vld [vmem:[#allocation2 + $0xaa] sm:$0xff]  ;;  %v894_v16 = vld [vmem:[#allocation2 + $0xb2] sm:$0xff]  ;;  %v3330_v42 = vld [vmem:[%s4118_s4 + $0x1c0] sm:$0xff]   ;;  %v3783_v54 = vpack.c.bf16 %v840_v40, %v839_v38 }
 0x13a   : > { %2732 = vmatpush3.bf16.msra.mxu0 %v3304_v6  ;;  %3040 = vmatpush3.bf16.msra.mxu1 %v3303_v3  ;;  %v3321_v3 = vld [vmem:[%s4118_s4 + $0x18] sm:$0xff]   ;;  %v837_v6 = vld [vmem:[#allocation2 + $0x48] sm:$0xff]  ;;  %v3765_v34 = vpack.c.bf16 %v894_v16, %v893_v13  ;;  %v3331_v46 = vld [vmem:[%s4118_s4 + $0x180] sm:$0xff]  }
 0x13b   : > { %2733 = vmatprep.subr.bf16.mxu0 %v3305_v7  ;;  %3041 = vmatprep.subr.bf16.mxu1 %v3306_v8  ;;  %v838_v7 = vld [vmem:[#allocation2 + $0x50] sm:$0xff]  ;;  %v3328_v57 = vld [vmem:[%s4118_s4 + $0x78] sm:$0xff]  }
 0x13c   : > { %v3753_v17 = vpack.c.bf16 %v838_v7, %v837_v6  ;;  %v896_v45 = vld [vmem:[#allocation2 + $0xca] sm:$0xff]  ;;  %v3329_v59 = vld [vmem:[%s4118_s4 + $0x38] sm:$0xff]   ;;  %v3332_v7 = vld [vmem:[%s4118_s4 + $0x80] sm:$0xff]  }
 0x13d   : > { %v3326_v47 = vld [vmem:[%s4118_s4 + $0x70] sm:$0xff]   ;;  %v841_v60 = vld [vmem:[#allocation2 + $0x78] sm:$0xff]  ;;  %v3333_v6 = vld [vmem:[%s4118_s4 + $0x1c8] sm:$0xff]  }
 0x13e   : > { %2734 = vmatpush3.bf16.msra.mxu0 %v3307_v9  ;;  %3042 = vmatpush3.bf16.msra.mxu1 %v3306_v8  ;;  %v891_v8 = vld [vmem:[#allocation2 + $0x92] sm:$0xff]  ;;  %v892_v9 = vld [vmem:[#allocation2 + $0x9a] sm:$0xff]  ;;  %v738_v53 = vld [vmem:[#allocation2 + $0x9] sm:$0xff] }
 0x13f   : > { %2735 = vmatprep.subr.bf16.mxu0 %v3308_v10  ;;  %3043 = vmatprep.subr.bf16.mxu1 %v3309_v11  ;;  %v3322_v10 = vld [vmem:[%s4118_s4 + $0x60] sm:$0xff]   ;;  %v3327_v55 = vld [vmem:[%s4118_s4 + $0x30] sm:$0xff]   ;;  %v844_v38 = vld [vmem:[#allocation2 + $0x98] sm:$0xff] }
 0x140   : > { %v3338_v40 = vld [vmem:[%s4118_s4 + $0x1d8] sm:$0xff]  }
 0x142   : > { %2736 = vmatpush3.bf16.msra.mxu0 %v3310_v12  ;;  %3044 = vmatpush3.bf16.msra.mxu1 %v3309_v11  ;;  %v863_v11 = vld [vmem:[#allocation2 + $0x61] sm:$0xff]  ;;  %v864_v12 = vld [vmem:[#allocation2 + $0x69] sm:$0xff] }
 0x143   : > { %2737 = vmatprep.subr.bf16.mxu0 %v3311_v20  ;;  %3045 = vmatprep.subr.bf16.mxu1 %v3312_v21  ;;  %v3755_v20 = vpack.c.bf16 %v892_v9, %v891_v8  ;;  %v3760_v27 = vpack.c.bf16 %v864_v12, %v863_v11  ;;  %v3334_v8 = vld [vmem:[%s4118_s4 + $0x188] sm:$0xff]   ;;  %v867_v9 = vld [vmem:[#allocation2 + $0x91] sm:$0xff] }
 0x144   : > { %v3336_v11 = vld [vmem:[%s4118_s4 + $0x1d0] sm:$0xff]  }
 0x146   : > { %2738 = vmatpush3.bf16.msra.mxu0 %v3313_v28  ;;  %3046 = vmatpush3.bf16.msra.mxu1 %v3312_v21  ;;  %v3323_v21 = vld [vmem:[%s4118_s4 + $0x20] sm:$0xff]   ;;  %v3324_v28 = vld [vmem:[%s4118_s4 + $0x68] sm:$0xff]  }
 0x147   : > { %2803 = vmatprep.subr.bf16.mxu1 %v3314_v41  ;;  %v895_v41 = vld [vmem:[#allocation2 + $0xc2] sm:$0xff]  ;;  %2883 = vmatprep.subr.bf16.mxu0 %v3330_v42  ;;  %v870_v42 = vld [vmem:[#allocation2 + $0xb1] sm:$0xff] }
 0x148   : > { %v3785_v39 = vpack.c.bf16 %v896_v45, %v895_v41  ;;  %v869_v41 = vld [vmem:[#allocation2 + $0xa9] sm:$0xff] }
 0x149   : > { %1131 = vmatmul.mubr.bf16.vlgmr.msra.gmra.mrb[16].mxu0 %v3705_v43  ;;  %3048 = vmatmul.mubr.bf16.vlgmr.msra.gmra.mrb[4].mxu1 %v3707_v44  ;;  %v3340_v45 = vld [vmem:[%s4118_s4 + $0x90] sm:$0xff]  }
 0x14a   : > { %2804 = vmatpush3.bf16.msra.mxu1 %v3315_v48  ;;  %1138 = vmatprep.mubr.bf16.mxu0 %v3712_v49  ;;  %v865_v48 = vld [vmem:[#allocation2 + $0x79] sm:$0xff] }
 0x14b   : > { %2805 = vmatprep.subr.bf16.mxu1 %v3316_v50  ;;  %3051 = vmatprep.mubr.bf16.mxu1 %v3717_v51  ;;  %v866_v50 = vld [vmem:[#allocation2 + $0x81] sm:$0xff] }
 0x14c   : > { %2884 = vmatpush3.bf16.msra.mxu0 %v3331_v46  ;;  %v3339_v46 = vld [vmem:[%s4118_s4 + $0x198] sm:$0xff]  }
 0x14d   : > { %2885 = vmatprep.subr.bf16.mxu0 %v3333_v6  ;;  %v3347_v6 = vld [vmem:[%s4118_s4 + $0x1b0] sm:$0xff]  }
 0x14e   : > { %2806 = vmatpush3.bf16.msra.mxu1 %v3317_v52  ;;  %v737_v52 = vld [vmem:[#allocation2 + $0x1] sm:$0xff] }
 0x14f   : > { %2807 = vmatprep.subr.bf16.mxu1 %v3318_v56  ;;  %v3790_v56 = vpack.c.bf16 %v866_v50, %v865_v48  ;;  %v753_v58 = vpack.c.bf16 %v738_v53, %v737_v52  ;;  %v3837_v48 = vpack.c.bf16 %v870_v42, %v869_v41  ;;  %v3342_v50 = vld [vmem:[%s4118_s4 + $0x1a0] sm:$0xff]   ;;  %v845_v52 = vld [vmem:[#allocation2 + $0xa8] sm:$0xff]  ;;  %v846_v53 = vld [vmem:[#allocation2 + $0xb0] sm:$0xff] }
 0x150   : > { %2886 = vmatpush3.bf16.msra.mxu0 %v3334_v8  ;;  %v3351_v8 = vld [vmem:[%s4118_s4 + $0xa8] sm:$0xff]   ;;  %v1646_v41 = vld [vmem:[#allocation2 + $0xe0] sm:$0xff]  ;;  %v3360_v42 = vld [vmem:[%s4118_s4 + $0x230] sm:$0xff]  }
 0x151   : > { %1139 = vmatmul.mubr.bf16.gmra.mrb[20].mxu0 %v3729_v61  ;;  %3052 = vmatmul.mubr.bf16.gmra.mrb[8].mxu1 %v3731_v62 }
 0x152   : > { %2808 = vmatpush3.bf16.msra.mxu1 %v3319_v63  ;;  %1146 = vmatprep.mubr.bf16.mxu0 %v3736_v0  ;;  %v842_v63 = vld [vmem:[#allocation2 + $0x80] sm:$0xff] }
 0x153   : > { %2809 = vmatprep.subr.bf16.mxu1 %v3320_v1  ;;  %3055 = vmatprep.mubr.bf16.mxu1 %v3741_v2  ;;  %v713_v1 = vld [vmem:[#allocation2] sm:$0xff]  ;;  %v3813_v12 = vpack.c.bf16 %v842_v63, %v841_v60  ;;  %v872_v60 = vld [vmem:[#allocation2 + $0xc9] sm:$0xff]  ;;  %v3861_v63 = vpack.c.bf16 %v846_v53, %v845_v52 }
 0x154   : > { %2887 = vmatprep.subr.bf16.mxu0 %v3336_v11  ;;  %v3349_v11 = vld [vmem:[%s4118_s4 + $0x1b8] sm:$0xff]  }
 0x156   : > { %2810 = vmatpush3.bf16.msra.mxu1 %v3321_v3  ;;  %v714_v3 = vld [vmem:[#allocation2 + $0x8] sm:$0xff] }
 0x157   : > { %2811 = vmatprep.subr.bf16.mxu1 %v3322_v10  ;;  %v868_v10 = vld [vmem:[#allocation2 + $0x99] sm:$0xff]  ;;  %v729_v13 = vpack.c.bf16 %v714_v3, %v713_v1  ;;  %v3346_v3 = vld [vmem:[%s4118_s4 + $0x1f0] sm:$0xff]  }
 0x158   : > { %v3815_v16 = vpack.c.bf16 %v868_v10, %v867_v9  ;;  %v3348_v9 = vld [vmem:[%s4118_s4 + $0x1f8] sm:$0xff]   ;;  %v848_v10 = vld [vmem:[#allocation2 + $0xc8] sm:$0xff] }
 0x159   : > { %1147 = vmatmul.mubr.bf16.gmra.mrb[24].mxu0 %v3753_v17  ;;  %3056 = vmatmul.mubr.bf16.gmra.mrb[12].mxu1 %v3755_v20 }
 0x15a   : > { %2812 = vmatpush3.bf16.msra.mxu1 %v3323_v21  ;;  %1154 = vmatprep.mubr.bf16.mxu0 %v3760_v27  ;;  %v3335_v21 = vld [vmem:[%s4118_s4 + $0x88] sm:$0xff]  }
 0x15b   : > { %2813 = vmatprep.subr.bf16.mxu1 %v3324_v28  ;;  %3059 = vmatprep.mubr.bf16.mxu1 %v3765_v34  ;;  %v3337_v28 = vld [vmem:[%s4118_s4 + $0x190] sm:$0xff]  }
 0x15c   : > { %2888 = vmatpush3.bf16.msra.mxu0 %v3337_v28  ;;  %v3353_v28 = vld [vmem:[%s4118_s4 + $0xb8] sm:$0xff]  }
 0x15d   : > { %2889 = vmatprep.subr.bf16.mxu0 %v3338_v40  ;;  %v1645_v40 = vld [vmem:[#allocation2 + $0xd8] sm:$0xff] }
 0x15e   : > { %2814 = vmatpush3.bf16.msra.mxu1 %v3325_v37  ;;  %v843_v37 = vld [vmem:[#allocation2 + $0x90] sm:$0xff] }
 0x15f   : > { %2815 = vmatprep.subr.bf16.mxu1 %v3326_v47  ;;  %v3835_v47 = vpack.c.bf16 %v844_v38, %v843_v37  ;;  %v3354_v37 = vld [vmem:[%s4118_s4 + $0x200] sm:$0xff]  }
 0x160   : > { %2890 = vmatpush3.bf16.msra.mxu0 %v3339_v46  ;;  %v3361_v46 = vld [vmem:[%s4118_s4 + $0x238] sm:$0xff]  }
 0x161   : > { %1155 = vmatmul.mubr.bf16.gmra.mrb[28].mxu0 %v3783_v54  ;;  %3060 = vmatmul.mubr.bf16.gmra.mrb[16].mxu1 %v3785_v39 }
 0x162   : > { %2816 = vmatpush3.bf16.msra.mxu1 %v3327_v55  ;;  %1162 = vmatprep.mubr.bf16.mxu0 %v3790_v56  ;;  %v3345_v55 = vld [vmem:[%s4118_s4 + $0x98] sm:$0xff]  }
 0x163   : > { %2817 = vmatprep.subr.bf16.mxu1 %v3328_v57  ;;  %1468 = vmatprep.mubr.bf16.mxu1 %v753_v58  ;;  %v3343_v57 = vld [vmem:[%s4118_s4 + $0x1e8] sm:$0xff]  }
 0x164   : > { %v3344_v58 = vld [vmem:[%s4118_s4 + $0x1a8] sm:$0xff]  }
 0x166   : > { %2818 = vmatpush3.bf16.msra.mxu1 %v3329_v59  ;;  %v871_v59 = vld [vmem:[#allocation2 + $0xc1] sm:$0xff] }
 0x167   : > { %3063 = vmatprep.subr.bf16.mxu1 %v3332_v7  ;;  %v3863_v1 = vpack.c.bf16 %v872_v60, %v871_v59  ;;  %v3369_v59 = vld [vmem:[%s4120_s6 + $0x38] sm:$0xff]  }
 0x169   : > { %1163 = vmatmul.mubr.bf16.gmra.mrb[32].mxu0 %v3813_v12  ;;  %1469 = vmatmul.mubr.bf16.vlgmr.msra.gmra.mrb[20].mxu1 %v729_v13  ;;  %v3352_v13 = vld [vmem:[%s4118_s4 + $0xb0] sm:$0xff]  }
 0x16a   : > { %3064 = vmatpush3.bf16.msra.mxu1 %v3332_v7  ;;  %1170 = vmatprep.mubr.bf16.mxu0 %v3815_v16  ;;  %v847_v7 = vld [vmem:[#allocation2 + $0xc0] sm:$0xff] }
 0x16b   : > { %1476 = vmatprep.mubr.bf16.mxu1 %v3693_v22  ;;  %3065 = vmatprep.subr.bf16.mxu1 %v3335_v21  ;;  %v3341_v22 = vld [vmem:[%s4118_s4 + $0x1e0] sm:$0xff]  }
 0x16c   : > { %2891 = vmatprep.subr.bf16.mxu0 %v3341_v22 }
 0x16d   : > { %2892 = vmatpush3.bf16.msra.mxu0 %v3342_v50 }
 0x16e   : > { %3066 = vmatpush3.bf16.msra.mxu1 %v3335_v21  ;;  %2893 = vmatprep.subr.bf16.mxu0 %v3343_v57  ;;  %v856_v21 = vpack.c.bf16 %v848_v10, %v847_v7 }
 0x16f   : > { %3067 = vmatprep.subr.bf16.mxu1 %v3340_v45 }
 0x171   : > { %1171 = vmatmul.mubr.bf16.gmra.mrb[36].mxu0 %v3835_v47  ;;  %1477 = vmatmul.mubr.bf16.gmra.mrb[24].mxu1 %v3705_v43  ;;  %v3350_v43 = vld [vmem:[%s4118_s4 + $0xa0] sm:$0xff]  }
 0x172   : > { %1178 = vmatprep.mubr.bf16.mxu0 %v3837_v48  ;;  %1484 = vmatprep.mubr.bf16.mxu1 %v3712_v49 }
 0x173   : > { %3068 = vmatpush3.bf16.msra.mxu1 %v3340_v45  ;;  %2894 = vmatpush3.bf16.msra.mxu0 %v3344_v58  ;;  %v1654_v45 = vpack.c.bf16 %v1646_v41, %v1645_v40 }
 0x174   : > { %3069 = vmatprep.subr.bf16.mxu1 %v3345_v55  ;;  %2895 = vmatprep.subr.bf16.mxu0 %v3346_v3 }
 0x177   : > { %3070 = vmatpush3.bf16.msra.mxu1 %v3345_v55  ;;  %2896 = vmatpush3.bf16.msra.mxu0 %v3347_v6 }
 0x178   : > { %3071 = vmatprep.subr.bf16.mxu1 %v3350_v43  ;;  %2897 = vmatprep.subr.bf16.mxu0 %v3348_v9 }
 0x179   : > { %1179 = vmatmul.mubr.bf16.gmra.mrb[40].mxu0 %v3861_v63  ;;  %1485 = vmatmul.mubr.bf16.gmra.mrb[28].mxu1 %v3729_v61 }
 0x17a   : > { %1186 = vmatprep.mubr.bf16.mxu0 %v3863_v1  ;;  %1492 = vmatprep.mubr.bf16.mxu1 %v3736_v0 }
 0x17b   : > { %3072 = vmatpush3.bf16.msra.mxu1 %v3350_v43  ;;  %2898 = vmatpush3.bf16.msra.mxu0 %v3349_v11 }
 0x17c   : > { %3073 = vmatprep.subr.bf16.mxu1 %v3351_v8 }
 0x17f   : > { %3074 = vmatpush3.bf16.msra.mxu1 %v3351_v8 }
 0x180   : > { %3075 = vmatprep.subr.bf16.mxu1 %v3352_v13 }
 0x181   : > { %1187 = vmatmul.mubr.bf16.gmra.mrb[44].mxu0 %v856_v21  ;;  %1493 = vmatmul.mubr.bf16.gmra.mrb[32].mxu1 %v3753_v17 }
 0x182   : > { %1500 = vmatprep.mubr.bf16.mxu1 %v3760_v27  ;;  %1928 = vmatprep.mubr.bf16.mxu0 %v3712_v49  ;;  %v761_v49 = vld [vmem:[#allocation2 + $0x2] sm:$0xff] }
 0x183   : > { %3076 = vmatpush3.bf16.msra.mxu1 %v3352_v13 }
 0x184   : > { %3077 = vmatprep.subr.bf16.mxu1 %v3353_v28 }
 0x187   : > { %3078 = vmatpush3.bf16.msra.mxu1 %v3353_v28 }
 0x188   : > { %3095 = vmatprep.subr.bf16.mxu1 %v3354_v37 }
 0x189   : > { %1501 = vmatmul.mubr.bf16.gmra.mrb[36].mxu1 %v3783_v54  ;;  %1929 = vmatmul.mubr.bf16.vlgmr.msra.gmra.mrb[48].mxu0 %v3729_v61  ;;  %v762_v61 = vld [vmem:[#allocation2 + $0xa] sm:$0xff] }
 0x18a   : > { %1508 = vmatprep.mubr.bf16.mxu1 %v3790_v56  ;;  %1936 = vmatprep.mubr.bf16.mxu0 %v3736_v0  ;;  %v777_v38 = vpack.c.bf16 %v762_v61, %v761_v49  ;;  %v3355_v0 = vld [vmem:[%s4118_s4 + $0x208] sm:$0xff]  }
 0x191   : > { %1509 = vmatmul.mubr.bf16.gmra.mrb[40].mxu1 %v3813_v12  ;;  %1937 = vmatmul.mubr.bf16.gmra.mrb[52].mxu0 %v3753_v17  ;;  %v3356_v17 = vld [vmem:[%s4118_s4 + $0x210] sm:$0xff]  }
 0x192   : > { %1516 = vmatprep.mubr.bf16.mxu1 %v3815_v16  ;;  %1944 = vmatprep.mubr.bf16.mxu0 %v3760_v27  ;;  %v3357_v27 = vld [vmem:[%s4118_s4 + $0x218] sm:$0xff]  }
 0x199   : > { %1517 = vmatmul.mubr.bf16.gmra.mrb[44].mxu1 %v3835_v47  ;;  %1945 = vmatmul.mubr.bf16.gmra.mrb[56].mxu0 %v3783_v54  ;;  %v1669_v54 = vld [vmem:[#allocation2 + $0xd9] sm:$0xff] }
 0x19a   : > { %1524 = vmatprep.mubr.bf16.mxu1 %v3837_v48  ;;  %1952 = vmatprep.mubr.bf16.mxu0 %v3790_v56  ;;  %v1670_v56 = vld [vmem:[#allocation2 + $0xe1] sm:$0xff] }
 0x1a1   : > { %1525 = vmatmul.mubr.bf16.gmra.mrb[48].mxu1 %v3861_v63  ;;  %1953 = vmatmul.mubr.bf16.gmra.mrb[60].mxu0 %v3813_v12  ;;  %v3359_v12 = vld [vmem:[%s4118_s4 + $0x228] sm:$0xff]  }
 0x1a2   : > { %3079 = vmatprep.mubr.bf16.mxu1 %v777_v38  ;;  %1960 = vmatprep.mubr.bf16.mxu0 %v3815_v16  ;;  %v1678_v16 = vpack.c.bf16 %v1670_v56, %v1669_v54 }
 0x1a9   : > { %3080 = vmatmul.mubr.bf16.vlgmr.msra.gmra.mrb[4].mxu1 %v3698_v33  ;;  %1961 = vmatmul.mubr.bf16.gmra.mrb[64].mxu0 %v3835_v47  ;;  %v3358_v33 = vld [vmem:[%s4118_s4 + $0x220] sm:$0xff]  }
 0x1aa   : > { %3096 = vmatpush3.bf16.msra.mxu1 %v3354_v37  ;;  %3083 = vmatprep.mubr.bf16.mxu1 %v3707_v44  ;;  %v1693_v47 = vld [vmem:[#allocation2 + $0xda] sm:$0xff] }
 0x1ab   : > { %3097 = vmatprep.subr.bf16.mxu1 %v3355_v0  ;;  %1968 = vmatprep.mubr.bf16.mxu0 %v3837_v48  ;;  %v1694_v48 = vld [vmem:[#allocation2 + $0xe2] sm:$0xff] }
 0x1ac   : > { %v1702_v22 = vpack.c.bf16 %v1694_v48, %v1693_v47 }
 0x1ae   : > { %3098 = vmatpush3.bf16.msra.mxu1 %v3355_v0 }
 0x1af   : > { %3099 = vmatprep.subr.bf16.mxu1 %v3356_v17 }
 0x1b1   : > { %3084 = vmatmul.mubr.bf16.gmra.mrb[8].mxu1 %v3717_v51  ;;  %1969 = vmatmul.mubr.bf16.gmra.mrb[68].mxu0 %v3861_v63 }
 0x1b2   : > { %3100 = vmatpush3.bf16.msra.mxu1 %v3356_v17  ;;  %3087 = vmatprep.mubr.bf16.mxu1 %v3731_v62 }
 0x1b3   : > { %3101 = vmatprep.subr.bf16.mxu1 %v3357_v27  ;;  %1976 = vmatprep.mubr.bf16.mxu0 %v3863_v1 }
 0x1b6   : > { %3102 = vmatpush3.bf16.msra.mxu1 %v3357_v27 }
 0x1b7   : > { %3103 = vmatprep.subr.bf16.mxu1 %v3358_v33 }
 0x1b9   : > { %3088 = vmatmul.mubr.bf16.gmra.mrb[12].mxu1 %v3741_v2  ;;  %1977 = vmatmul.mubr.bf16.gmra.mrb[72].mxu0 %v856_v21 }
 0x1ba   : > { %3104 = vmatpush3.bf16.msra.mxu1 %v3358_v33  ;;  %3091 = vmatprep.mubr.bf16.mxu1 %v3755_v20 }
 0x1bb   : > { %3105 = vmatprep.subr.bf16.mxu1 %v3359_v12  ;;  %1984 = vmatprep.mubr.bf16.mxu0 %v1678_v16 }
 0x1be   : > { %3106 = vmatpush3.bf16.msra.mxu1 %v3359_v12 }
 0x1bf   : > { %3107 = vmatprep.subr.bf16.mxu1 %v3360_v42 }
 0x1c1   : > { %3092 = vmatmul.mubr.bf16.gmra.mrb[16].mxu1 %v3765_v34  ;;  %1985 = vmatmul.mubr.bf16.gmra.mrb[76].mxu0 %v1654_v45 }
 0x1c2   : > { %3108 = vmatpush3.bf16.msra.mxu1 %v3360_v42  ;;  %3111 = vmatprep.mubr.bf16.mxu1 %v3707_v44  ;;  %v3362_v44 = vld [vmem:[%s4120_s6] sm:$0xff]  }
 0x1c3   : > { %3109 = vmatprep.subr.bf16.mxu1 %v3361_v46  ;;  %3127 = vmatprep.subr.bf16.mxu0 %v3362_v44 }
 0x1c4   : > { %3128 = vmatpush3.bf16.msra.mxu0 %v3362_v44 }
 0x1c6   : > { %3110 = vmatpush3.bf16.msra.mxu1 %v3361_v46 }
 0x1c9   : > { %3112 = vmatmul.mubr.bf16.vlgmr.msra.gmra.mrb[4].mxu1 %v3717_v51  ;;  %v3363_v51 = vld [vmem:[%s4120_s6 + $0x8] sm:$0xff]  }
 0x1ca   : > { %3115 = vmatprep.mubr.bf16.mxu1 %v3731_v62  ;;  %3129 = vmatprep.subr.bf16.mxu0 %v3363_v51  ;;  %v3364_v62 = vld [vmem:[%s4120_s6 + $0x10] sm:$0xff]  }
 0x1cb   : > { %3130 = vmatpush3.bf16.msra.mxu0 %v3363_v51 }
 0x1cc   : > { %3131 = vmatprep.subr.bf16.mxu0 %v3364_v62 }
 0x1cf   : > { %3132 = vmatpush3.bf16.msra.mxu0 %v3364_v62 }
 0x1d1   : > { %3116 = vmatmul.mubr.bf16.gmra.mrb[8].mxu1 %v3741_v2  ;;  %v3365_v2 = vld [vmem:[%s4120_s6 + $0x18] sm:$0xff]  }
 0x1d2   : > { %3119 = vmatprep.mubr.bf16.mxu1 %v3755_v20  ;;  %3133 = vmatprep.subr.bf16.mxu0 %v3365_v2  ;;  %v3366_v20 = vld [vmem:[%s4120_s6 + $0x20] sm:$0xff]  }
 0x1d3   : > { %3134 = vmatpush3.bf16.msra.mxu0 %v3365_v2 }
 0x1d4   : > { %3135 = vmatprep.subr.bf16.mxu0 %v3366_v20 }
 0x1d7   : > { %3136 = vmatpush3.bf16.msra.mxu0 %v3366_v20 }
 0x1d9   : > { %3120 = vmatmul.mubr.bf16.gmra.mrb[12].mxu1 %v3765_v34  ;;  %v3367_v34 = vld [vmem:[%s4120_s6 + $0x28] sm:$0xff]  }
 0x1da   : > { %3123 = vmatprep.mubr.bf16.mxu1 %v3785_v39  ;;  %3137 = vmatprep.subr.bf16.mxu0 %v3367_v34  ;;  %v3368_v39 = vld [vmem:[%s4120_s6 + $0x30] sm:$0xff]  }
 0x1db   : > { %3138 = vmatpush3.bf16.msra.mxu0 %v3367_v34 }
 0x1dc   : > { %3139 = vmatprep.subr.bf16.mxu0 %v3368_v39 }
 0x1df   : > { %3140 = vmatpush3.bf16.msra.mxu0 %v3368_v39 }
 0x1e0   : > { %3141 = vmatprep.subr.bf16.mxu0 %v3369_v59 }
 0x1e1   : > { %3124 = vmatmul.mubr.bf16.gmra.mrb[16].mxu1 %v1702_v22 }
 0x1e3   : > { %3142 = vmatpush3.bf16.msra.mxu0 %v3369_v59 }
 0x21c   : > { %v2739_v50 = vpop.f32.mrb[16].mxu0 }
 0x21d   : > { %v2740_v52 = vpop.f32.mrb[17].mxu0 }
 0x21e   : > { %v2741_v53 = vadd.f32 %v2740_v52, %v2739_v50  ;;  %v2742_v55 = vpop.f32.mrb[18].mxu0 }
 0x21f   : > { %v2743_v57 = vpop.f32.mrb[19].mxu0 }
 0x220   : > { %v2744_v58 = vadd.f32 %v2743_v57, %v2742_v55 }
 0x224   : > { %v2745_v60 = vpop.f32.mrb[20].mxu0 }
 0x225   : > { %v2746_v43 = vpop.f32.mrb[21].mxu0 }
 0x226   : > { %v2747_v63 = vadd.f32 %v2746_v43, %v2745_v60  ;;  %v2748_v1 = vpop.f32.mrb[22].mxu0 }
 0x227   : > { %v2749_v3 = vpop.f32.mrb[23].mxu0 }
 0x228   : > { %v2750_v6 = vadd.f32 %v2749_v3, %v2748_v1 }
 0x22c   : > { %v2751_v7 = vpop.f32.mrb[24].mxu0 }
 0x22d   : > { %v2752_v8 = vpop.f32.mrb[25].mxu0 }
 0x22e   : > { %v2753_v9 = vadd.f32 %v2752_v8, %v2751_v7  ;;  %v2754_v10 = vpop.f32.mrb[26].mxu0 }
 0x22f   : > { %v2755_v11 = vpop.f32.mrb[27].mxu0 }
 0x230   : > { %v2756_v13 = vadd.f32 %v2755_v11, %v2754_v10 }
 0x234   : > { %v2757_v21 = vpop.f32.mrb[28].mxu0 }
 0x235   : > { %v2758_v28 = vpop.f32.mrb[29].mxu0 }
 0x236   : > { %v2759_v37 = vadd.f32 %v2758_v28, %v2757_v21  ;;  %v2760_v49 = vpop.f32.mrb[30].mxu0 }
 0x237   : > { %v2761_v61 = vpop.f32.mrb[31].mxu0 }
 0x238   : > { %v2762_v38 = vadd.f32 %v2761_v61, %v2760_v49 }
 0x23c   : > { %v2819_v0 = vpop.f32.mrb[20].mxu1  ;;  %v2763_v17 = vpop.f32.mrb[32].mxu0 }
 0x23d   : > { %v2820_v27 = vpop.f32.mrb[21].mxu1  ;;  %v2764_v33 = vpop.f32.mrb[33].mxu0 }
 0x23e   : > { %v2821_v54 = vadd.f32 %v2820_v27, %v2819_v0  ;;  %v2822_v56 = vpop.f32.mrb[22].mxu1  ;;  %v2765_v12 = vadd.f32 %v2764_v33, %v2763_v17  ;;  %v2766_v16 = vpop.f32.mrb[34].mxu0 }
 0x23f   : > { %v2823_v40 = vpop.f32.mrb[23].mxu1  ;;  %v2767_v41 = vpop.f32.mrb[35].mxu0 }
 0x240   : > { %v3162_v42 = vadd.f32 %v2821_v54, %v2741_v53  ;;  %v2824_v45 = vadd.f32 %v2823_v40, %v2822_v56  ;;  %v2768_v46 = vadd.f32 %v2767_v41, %v2766_v16 }
 0x242   : > { %v3168_v47 = vadd.f32 %v2824_v45, %v2744_v58 }
 0x244   : > { %v2825_v48 = vpop.f32.mrb[24].mxu1  ;;  %v2769_v22 = vpop.f32.mrb[36].mxu0 }
 0x245   : > { %v2826_v44 = vpop.f32.mrb[25].mxu1  ;;  %v2770_v51 = vpop.f32.mrb[37].mxu0 }
 0x246   : > { %v2827_v62 = vadd.f32 %v2826_v44, %v2825_v48  ;;  %v2828_v2 = vpop.f32.mrb[26].mxu1  ;;  %v2771_v20 = vadd.f32 %v2770_v51, %v2769_v22  ;;  %v2772_v34 = vpop.f32.mrb[38].mxu0 }
 0x247   : > { %v2829_v39 = vpop.f32.mrb[27].mxu1  ;;  %v2773_v50 = vpop.f32.mrb[39].mxu0 }
 0x248   : > { %v3159_v52 = vadd.f32 %v2827_v62, %v2747_v63  ;;  %v2830_v55 = vadd.f32 %v2829_v39, %v2828_v2  ;;  %v2774_v57 = vadd.f32 %v2773_v50, %v2772_v34 }
 0x24a   : > { %v3165_v59 = vadd.f32 %v2830_v55, %v2750_v6 }
 0x24c   : > { %v2831_v60 = vpop.f32.mrb[28].mxu1  ;;  %v2775_v43 = vpop.f32.mrb[40].mxu0 }
 0x24d   : > { %v2832_v53 = vpop.f32.mrb[29].mxu1  ;;  %v2776_v1 = vpop.f32.mrb[41].mxu0 }
 0x24e   : > { %v2833_v3 = vadd.f32 %v2832_v53, %v2831_v60  ;;  %v2834_v58 = vpop.f32.mrb[30].mxu1  ;;  %v3974_v7 = vadd.f32 %v2776_v1, %v2775_v43  ;;  %v2778_v8 = vpop.f32.mrb[42].mxu0 }
 0x24f   : > { %v2835_v10 = vpop.f32.mrb[31].mxu1  ;;  %v2779_v11 = vpop.f32.mrb[43].mxu0 }
 0x250   : > { %v3976_v21 = vadd.f32 %v2833_v3, %v2753_v9  ;;  %v2836_v28 = vadd.f32 %v2835_v10, %v2834_v58  ;;  %v2780_v49 = vadd.f32 %v2779_v11, %v2778_v8 }
 0x252   : > { %v3180_v61 = vadd.f32 %v2836_v28, %v2756_v13 }
 0x254   : > { %v2837_v63 = vpop.f32.mrb[32].mxu1  ;;  %v2781_v0 = vpop.f32.mrb[44].mxu0 }
 0x255   : > { %v2838_v17 = vpop.f32.mrb[33].mxu1  ;;  %v2782_v6 = vpop.f32.mrb[45].mxu0 }
 0x256   : > { %v2839_v27 = vadd.f32 %v2838_v17, %v2837_v63  ;;  %v2840_v33 = vpop.f32.mrb[34].mxu1  ;;  %v3978_v54 = vadd.f32 %v2782_v6, %v2781_v0  ;;  %v2784_v56 = vpop.f32.mrb[46].mxu0 }
 0x257   : > { %v2841_v16 = vpop.f32.mrb[35].mxu1  ;;  %v2785_v40 = vpop.f32.mrb[47].mxu0 }
 0x258   : > { %v3980_v41 = vadd.f32 %v2839_v27, %v2759_v37  ;;  %v2842_v45 = vadd.f32 %v2841_v16, %v2840_v33  ;;  %v3982_v48 = vadd.f32 %v2785_v40, %v2784_v56 }
 0x25a   : > { %v3984_v9 = vadd.f32 %v2842_v45, %v2762_v38 }
 0x25c   : > { %v2843_v22 = vpop.f32.mrb[36].mxu1  ;;  %v2899_v13 = vpop.f32.mrb[48].mxu0 }
 0x25d   : > { %v2844_v44 = vpop.f32.mrb[37].mxu1  ;;  %v2900_v51 = vpop.f32.mrb[49].mxu0 }
 0x25e   : > { %v2845_v62 = vadd.f32 %v2844_v44, %v2843_v22  ;;  %v2901_v2 = vadd.f32 %v2900_v51, %v2899_v13  ;;  %v2846_v34 = vpop.f32.mrb[38].mxu1  ;;  %v2902_v39 = vpop.f32.mrb[50].mxu0 }
 0x25f   : > { %v2847_v50 = vpop.f32.mrb[39].mxu1  ;;  %v2903_v55 = vpop.f32.mrb[51].mxu0 }
 0x260   : > { %v3186_v60 = vadd.f32 %v2845_v62, %v2765_v12  ;;  %v2848_v43 = vadd.f32 %v2847_v50, %v2846_v34  ;;  %v2904_v53 = vadd.f32 %v2903_v55, %v2902_v39  ;;  %v3986_v37 = vadd.f32 %v3162_v42, %v2901_v2 }
 0x262   : > { %v3192_v1 = vadd.f32 %v2848_v43, %v2768_v46  ;;  %v3988_v3 = vadd.f32 %v3168_v47, %v2904_v53 }
 0x264   : > { %v2849_v38 = vpop.f32.mrb[40].mxu1  ;;  %v2905_v58 = vpop.f32.mrb[52].mxu0 }
 0x265   : > { %v2850_v8 = vpop.f32.mrb[41].mxu1  ;;  %v2906_v10 = vpop.f32.mrb[53].mxu0 }
 0x266   : > { %v2851_v11 = vadd.f32 %v2850_v8, %v2849_v38  ;;  %v2907_v28 = vadd.f32 %v2906_v10, %v2905_v58  ;;  %v2852_v63 = vpop.f32.mrb[42].mxu1  ;;  %v2908_v0 = vpop.f32.mrb[54].mxu0 }
 0x267   : > { %v2853_v17 = vpop.f32.mrb[43].mxu1  ;;  %v2909_v6 = vpop.f32.mrb[55].mxu0 }
 0x268   : > { %v3183_v27 = vadd.f32 %v2851_v11, %v2771_v20  ;;  %v2854_v33 = vadd.f32 %v2853_v17, %v2852_v63  ;;  %v2910_v12 = vadd.f32 %v2909_v6, %v2908_v0  ;;  %v3990_v56 = vadd.f32 %v3159_v52, %v2907_v28 }
 0x26a   : > { %v3189_v42 = vadd.f32 %v2854_v33, %v2774_v57  ;;  %v3992_v16 = vadd.f32 %v3165_v59, %v2910_v12 }
 0x26c   : > { %v2855_v46 = vpop.f32.mrb[44].mxu1  ;;  %v2911_v47 = vpop.f32.mrb[56].mxu0 }
 0x26d   : > { %v2856_v40 = vpop.f32.mrb[45].mxu1  ;;  %v2912_v45 = vpop.f32.mrb[57].mxu0 }
 0x26e   : > { %v2857_v22 = vadd.f32 %v2856_v40, %v2855_v46  ;;  %v2913_v13 = vadd.f32 %v2912_v45, %v2911_v47  ;;  %v2858_v44 = vpop.f32.mrb[46].mxu1  ;;  %v2914_v51 = vpop.f32.mrb[58].mxu0 }
 0x26f   : > { %v2859_v62 = vpop.f32.mrb[47].mxu1  ;;  %v2915_v2 = vpop.f32.mrb[59].mxu0 }
 0x270   : > { %v3198_v34 = vadd.f32 %v2857_v22, %v3974_v7  ;;  %v2860_v20 = vadd.f32 %v2859_v62, %v2858_v44  ;;  %v2916_v39 = vadd.f32 %v2915_v2, %v2914_v51  ;;  %v3996_v52 = vadd.f32 %v3976_v21, %v2913_v13 }
 0x272   : > { %v3204_v57 = vadd.f32 %v2860_v20, %v2780_v49  ;;  %v3998_v59 = vadd.f32 %v3180_v61, %v2916_v39 }
 0x274   : > { %v2861_v50 = vpop.f32.mrb[48].mxu1  ;;  %v2917_v55 = vpop.f32.mrb[60].mxu0 }
 0x275   : > { %v2862_v43 = vpop.f32.mrb[49].mxu1  ;;  %v2918_v53 = vpop.f32.mrb[61].mxu0 }
 0x276   : > { %v2863_v38 = vadd.f32 %v2862_v43, %v2861_v50  ;;  %v2919_v58 = vadd.f32 %v2918_v53, %v2917_v55  ;;  %v2864_v8 = vpop.f32.mrb[50].mxu1  ;;  %v2920_v10 = vpop.f32.mrb[62].mxu0 }
 0x277   : > { %v2865_v11 = vpop.f32.mrb[51].mxu1  ;;  %v2921_v28 = vpop.f32.mrb[63].mxu0 }
 0x278   : > { %v3195_v7 = vadd.f32 %v2863_v38, %v3978_v54  ;;  %v2866_v63 = vadd.f32 %v2865_v11, %v2864_v8  ;;  %v2922_v0 = vadd.f32 %v2921_v28, %v2920_v10  ;;  %v3172_v21 = vadd.f32 %v3980_v41, %v2919_v58 }
 0x27a   : > { %v3201_v49 = vadd.f32 %v2866_v63, %v3982_v48  ;;  %v3178_v61 = vadd.f32 %v3984_v9, %v2922_v0 }
 0x27c   : > { %v2923_v17 = vpop.f32.mrb[64].mxu0 }
 0x27d   : > { %v2924_v6 = vpop.f32.mrb[65].mxu0 }
 0x27e   : > { %v2925_v33 = vadd.f32 %v2924_v6, %v2923_v17  ;;  %v2926_v12 = vpop.f32.mrb[66].mxu0 }
 0x27f   : > { %v2927_v46 = vpop.f32.mrb[67].mxu0 }
 0x280   : > { %v2928_v47 = vadd.f32 %v2927_v46, %v2926_v12  ;;  %v4004_v40 = vadd.f32 %v3186_v60, %v2925_v33 }
 0x282   : > { %v4006_v45 = vadd.f32 %v3192_v1, %v2928_v47 }
 0x284   : > { %v2929_v22 = vpop.f32.mrb[68].mxu0 }
 0x285   : > { %v2930_v54 = vpop.f32.mrb[69].mxu0 }
 0x286   : > { %v2931_v13 = vadd.f32 %v2930_v54, %v2929_v22  ;;  %v2932_v44 = vpop.f32.mrb[70].mxu0 }
 0x287   : > { %v2933_v51 = vpop.f32.mrb[71].mxu0 }
 0x288   : > { %v2934_v41 = vadd.f32 %v2933_v51, %v2932_v44  ;;  %v3184_v62 = vadd.f32 %v3183_v27, %v2931_v13 }
 0x28a   : > { %v3190_v48 = vadd.f32 %v3189_v42, %v2934_v41  ;;  %v4017_v42 = vld [vmem:[%s4119_s5] ss:$0 sm:$0xff] }
 0x28c   : > { %v2935_v2 = vpop.f32.mrb[72].mxu0 }
 0x28d   : > { %v2936_v9 = vpop.f32.mrb[73].mxu0 }
 0x28e   : > { %v2937_v20 = vadd.f32 %v2936_v9, %v2935_v2  ;;  %v2938_v39 = vpop.f32.mrb[74].mxu0 }
 0x28f   : > { %v2939_v50 = vpop.f32.mrb[75].mxu0 }
 0x290   : > { %v2940_v55 = vadd.f32 %v2939_v50, %v2938_v39  ;;  %v4008_v43 = vadd.f32 %v3198_v34, %v2937_v20 }
 0x292   : > { %v4010_v60 = vadd.f32 %v3204_v57, %v2940_v55 }
 0x294   : > { %v2941_v1 = vpop.f32.mrb[76].mxu0 }
 0x295   : > { %v2942_v53 = vpop.f32.mrb[77].mxu0 }
 0x296   : > { %v2943_v38 = vadd.f32 %v2942_v53, %v2941_v1  ;;  %v2944_v58 = vpop.f32.mrb[78].mxu0 }
 0x297   : > { %v2945_v8 = vpop.f32.mrb[79].mxu0 }
 0x298   : > { %v2946_v10 = vadd.f32 %v2945_v8, %v2944_v58  ;;  %v3196_v11 = vadd.f32 %v3195_v7, %v2943_v38 }
 0x29a   : > { %v4012_v28 = vadd.f32 %v3201_v49, %v2946_v10 }
 0x29c   : > { %v3113_v27 = vpop.f32.mrb[4].mxu1 }
 0x29d   : > { %v3161_v34 = vadd.f32 %v3990_v56, %v3113_v27  ;;  %v2027_v63 = vpop.f32.mrb[5].mxu1 }
 0x29e   : > { %v3164_v57 = vadd.f32 %v3986_v37, %v2027_v63  ;;  %v3114_v0 = vpop.f32.mrb[6].mxu1 }
 0x29f   : > { %v2115_v17 = vadd.f32 %v3161_v34, %v4017_v42  ;;  %v3167_v6 = vadd.f32 %v3992_v16, %v3114_v0  ;;  %v2030_v33 = vpop.f32.mrb[7].mxu1 }
 0x2a0   : > { %v2113_v7 = vadd.f32 %v3164_v57, %v4017_v42  ;;  %v3170_v49 = vadd.f32 %v3988_v3, %v2030_v33 }
 0x2a1   : > { %v2116_v12 = vadd.f32 %v3167_v6, %v4017_v42  ;;  %v2131_v47 = vmax.f32 %v2115_v17, 0.0 }
 0x2a2   : > { %v2114_v46 = vadd.f32 %v3170_v49, %v4017_v42  ;;  %v2129_v56 = vmax.f32 %v2113_v7, 0.0 }
 0x2a3   : > { %v2132_v22 = vmax.f32 %v2116_v12, 0.0 }
 0x2a4   : > { %v2130_v54 = vmax.f32 %v2114_v46, 0.0  ;;  %v3117_v13 = vpop.f32.mrb[8].mxu1 }
 0x2a5   : > { %v2146_v37 = vpack.c.bf16 %v2132_v22, %v2131_v47  ;;  %v3173_v44 = vadd.f32 %v3172_v21, %v3117_v13  ;;  %v2043_v51 = vpop.f32.mrb[9].mxu1 }
 0x2a6   : > { %v3176_v41 = vadd.f32 %v3996_v52, %v2043_v51  ;;  %v3118_v16 = vpop.f32.mrb[10].mxu1  ;;  %v2145_v2 = vpack.c.bf16 %v2130_v54, %v2129_v56 }
 0x2a7   : > { %v2119_v9 = vadd.f32 %v3173_v44, %v4017_v42  ;;  %v3179_v20 = vadd.f32 %v3178_v61, %v3118_v16  ;;  %v2046_v3 = vpop.f32.mrb[11].mxu1 }
 0x2a8   : > { %v2117_v39 = vadd.f32 %v3176_v41, %v4017_v42  ;;  %v3182_v50 = vadd.f32 %v3998_v59, %v2046_v3  ;;  %3143 = vmatprep.mubr.bf16.mxu0 %v2145_v2 }
 0x2a9   : > { %v2120_v55 = vadd.f32 %v3179_v20, %v4017_v42  ;;  %3144 = vmatmul.mubr.bf16.vlgmr.msra.gmra.mrb[80].mxu0 %v2146_v37  ;;  %v2135_v21 = vmax.f32 %v2119_v9, 0.0 }
 0x2aa   : > { %v2118_v1 = vadd.f32 %v3182_v50, %v4017_v42  ;;  %v2133_v38 = vmax.f32 %v2117_v39, 0.0 }
 0x2ab   : > { %v2136_v53 = vmax.f32 %v2120_v55, 0.0 }
 0x2ac   : > { %v2134_v52 = vmax.f32 %v2118_v1, 0.0  ;;  %v3121_v58 = vpop.f32.mrb[12].mxu1 }
 0x2ad   : > { %v3185_v8 = vadd.f32 %v3184_v62, %v3121_v58  ;;  %v2059_v10 = vpop.f32.mrb[13].mxu1  ;;  %v2148_v27 = vpack.c.bf16 %v2136_v53, %v2135_v21 }
 0x2ae   : > { %v3188_v61 = vadd.f32 %v4004_v40, %v2059_v10  ;;  %v3122_v34 = vpop.f32.mrb[14].mxu1  ;;  %v2147_v63 = vpack.c.bf16 %v2134_v52, %v2133_v38 }
 0x2af   : > { %v2123_v59 = vadd.f32 %v3185_v8, %v4017_v42  ;;  %v3191_v57 = vadd.f32 %v3190_v48, %v3122_v34  ;;  %v2062_v0 = vpop.f32.mrb[15].mxu1 }
 0x2b0   : > { %v2121_v17 = vadd.f32 %v3188_v61, %v4017_v42  ;;  %v3194_v6 = vadd.f32 %v4006_v45, %v2062_v0  ;;  %3147 = vmatprep.mubr.bf16.mxu0 %v2147_v63 }
 0x2b1   : > { %v2124_v33 = vadd.f32 %v3191_v57, %v4017_v42  ;;  %3148 = vmatmul.mubr.bf16.gmra.mrb[84].mxu0 %v2148_v27  ;;  %v2139_v7 = vmax.f32 %v2123_v59, 0.0 }
 0x2b2   : > { %v2122_v62 = vadd.f32 %v3194_v6, %v4017_v42  ;;  %v2137_v12 = vmax.f32 %v2121_v17, 0.0 }
 0x2b3   : > { %v2140_v49 = vmax.f32 %v2124_v33, 0.0 }
 0x2b4   : > { %v2138_v40 = vmax.f32 %v2122_v62, 0.0  ;;  %v3125_v46 = vpop.f32.mrb[16].mxu1 }
 0x2b5   : > { %v3197_v47 = vadd.f32 %v3196_v11, %v3125_v46  ;;  %v2075_v22 = vpop.f32.mrb[17].mxu1  ;;  %v2150_v56 = vpack.c.bf16 %v2140_v49, %v2139_v7 }
 0x2b6   : > { %v3200_v48 = vadd.f32 %v4008_v43, %v2075_v22  ;;  %v3126_v54 = vpop.f32.mrb[18].mxu1  ;;  %v2149_v13 = vpack.c.bf16 %v2138_v40, %v2137_v12 }
 0x2b7   : > { %v2127_v45 = vadd.f32 %v3197_v47, %v4017_v42  ;;  %v3203_v37 = vadd.f32 %v4012_v28, %v3126_v54  ;;  %v2078_v44 = vpop.f32.mrb[19].mxu1  ;;  %v4049_v28 = vld [vmem:[%s4121_s7] ss:$0 sm:$0xff] }
 0x2b8   : > { %v2125_v51 = vadd.f32 %v3200_v48, %v4017_v42  ;;  %v3206_v41 = vadd.f32 %v4010_v60, %v2078_v44  ;;  %3151 = vmatprep.mubr.bf16.mxu0 %v2149_v13 }
 0x2b9   : > { %v2128_v16 = vadd.f32 %v3203_v37, %v4017_v42  ;;  %3152 = vmatmul.mubr.bf16.gmra.mrb[88].mxu0 %v2150_v56  ;;  %v2143_v2 = vmax.f32 %v2127_v45, 0.0 }
 0x2ba   : > { %v2126_v11 = vadd.f32 %v3206_v41, %v4017_v42  ;;  %v2141_v43 = vmax.f32 %v2125_v51, 0.0 }
 0x2bb   : > { %v2144_v9 = vmax.f32 %v2128_v16, 0.0 }
 0x2bc   : > { %v2142_v20 = vmax.f32 %v2126_v11, 0.0 }
 0x2bd   : > { %v2152_v3 = vpack.c.bf16 %v2144_v9, %v2143_v2 }
 0x2be   : > { %v2151_v39 = vpack.c.bf16 %v2142_v20, %v2141_v43 }
 0x2c0   : > { %3155 = vmatprep.mubr.bf16.mxu0 %v2151_v39 }
 0x2c1   : > { %3156 = vmatmul.mubr.bf16.gmra.mrb[92].mxu0 %v2152_v3 }
 0x37c   : > { %v3145_v60 = vpop.f32.mrb[80].mxu0 }
 0x37d   : > { %v2267_v50 = vadd.f32 %v3145_v60, %v4049_v28  ;;  %v2258_v55 = vpop.f32.mrb[81].mxu0 }
 0x37e   : > { %v2259_v42 = vadd.f32 %v4049_v28, %v2258_v55  ;;  %v3146_v1 = vpop.f32.mrb[82].mxu0 }
 0x37f   : > { %v2323_v21 = vadd.f32 %v2267_v50, %v3542_v14  ;;  %v2270_v53 = vadd.f32 %v3146_v1, %v4049_v28  ;;  %v2261_v38 = vpop.f32.mrb[83].mxu0 }
 0x380   : > { %v2321_v52 = vadd.f32 %v2259_v42, %v3518_v4  ;;  %v2262_v58 = vadd.f32 %v4049_v28, %v2261_v38 }
 0x381   : > { %v2339_v8 = vmax.f32 %v2323_v21, 0.0  ;;  %v2324_v10 = vadd.f32 %v2270_v53, %v3545_v15 }
 0x382   : > { %v2337_v27 = vmax.f32 %v2321_v52, 0.0  ;;  %v2322_v61 = vadd.f32 %v2262_v58, %v3521_v5 }
 0x383   : > { %2355 = vst [vmem:[%s3515_s16 + $0x10] sm:$0xff] %v2339_v8  ;;  %v2340_v34 = vmax.f32 %v2324_v10, 0.0 }
 0x384   : > { %2353 = vst [vmem:[%s3515_s16] sm:$0xff] %v2337_v27  ;;  %v2338_v63 = vmax.f32 %v2322_v61, 0.0  ;;  %v3149_v59 = vpop.f32.mrb[84].mxu0 }
 0x385   : > { %2356 = vst [vmem:[%s3515_s16 + $0x18] sm:$0xff] %v2340_v34  ;;  %v2283_v14 = vadd.f32 %v3149_v59, %v4049_v28  ;;  %v2274_v57 = vpop.f32.mrb[85].mxu0 }
 0x386   : > { %2354 = vst [vmem:[%s3515_s16 + $0x8] sm:$0xff] %v2338_v63  ;;  %v2275_v4 = vadd.f32 %v4049_v28, %v2274_v57  ;;  %v3150_v0 = vpop.f32.mrb[86].mxu0 }
 0x387   : > { %v2327_v15 = vadd.f32 %v2283_v14, %v3558_v23  ;;  %v2286_v5 = vadd.f32 %v3150_v0, %v4049_v28  ;;  %v2277_v17 = vpop.f32.mrb[87].mxu0 }
 0x388   : > { %v2325_v6 = vadd.f32 %v2275_v4, %v3548_v18  ;;  %v2278_v33 = vadd.f32 %v4049_v28, %v2277_v17 }
 0x389   : > { %v2343_v62 = vmax.f32 %v2327_v15, 0.0  ;;  %v2328_v7 = vadd.f32 %v2286_v5, %v3561_v24 }
 0x38a   : > { %v2341_v49 = vmax.f32 %v2325_v6, 0.0  ;;  %v2326_v12 = vadd.f32 %v2278_v33, %v3551_v19 }
 0x38b   : > { %2359 = vst [vmem:[%s3515_s16 + $0x30] sm:$0xff] %v2343_v62  ;;  %v2344_v40 = vmax.f32 %v2328_v7, 0.0 }
 0x38c   : > { %2357 = vst [vmem:[%s3515_s16 + $0x20] sm:$0xff] %v2341_v49  ;;  %v2342_v46 = vmax.f32 %v2326_v12, 0.0  ;;  %v3153_v47 = vpop.f32.mrb[88].mxu0 }
 0x38d   : > { %2360 = vst [vmem:[%s3515_s16 + $0x38] sm:$0xff] %v2344_v40  ;;  %v2299_v23 = vadd.f32 %v3153_v47, %v4049_v28  ;;  %v2290_v22 = vpop.f32.mrb[89].mxu0 }
 0x38e   : > { %2358 = vst [vmem:[%s3515_s16 + $0x28] sm:$0xff] %v2342_v46  ;;  %v2291_v18 = vadd.f32 %v4049_v28, %v2290_v22  ;;  %v3154_v56 = vpop.f32.mrb[90].mxu0 }
 0x38f   : > { %v2331_v24 = vadd.f32 %v2299_v23, %v3574_v29  ;;  %v2302_v19 = vadd.f32 %v3154_v56, %v4049_v28  ;;  %v2293_v48 = vpop.f32.mrb[91].mxu0 }
 0x390   : > { %v2329_v54 = vadd.f32 %v2291_v18, %v3564_v25  ;;  %v2294_v13 = vadd.f32 %v4049_v28, %v2293_v48 }
 0x391   : > { %v2347_v45 = vmax.f32 %v2331_v24, 0.0  ;;  %v2332_v37 = vadd.f32 %v2302_v19, %v3577_v30 }
 0x392   : > { %v2345_v44 = vmax.f32 %v2329_v54, 0.0  ;;  %v2330_v51 = vadd.f32 %v2294_v13, %v3567_v26 }
 0x393   : > { %2363 = vst [vmem:[%s3515_s16 + $0x50] sm:$0xff] %v2347_v45  ;;  %v2348_v41 = vmax.f32 %v2332_v37, 0.0 }
 0x394   : > { %2361 = vst [vmem:[%s3515_s16 + $0x40] sm:$0xff] %v2345_v44  ;;  %v2346_v16 = vmax.f32 %v2330_v51, 0.0  ;;  %v3157_v11 = vpop.f32.mrb[92].mxu0 }
 0x395   : > { %2364 = vst [vmem:[%s3515_s16 + $0x58] sm:$0xff] %v2348_v41  ;;  %v2315_v29 = vadd.f32 %v3157_v11, %v4049_v28  ;;  %v2306_v2 = vpop.f32.mrb[93].mxu0 }
 0x396   : > { %2362 = vst [vmem:[%s3515_s16 + $0x48] sm:$0xff] %v2346_v16  ;;  %v2307_v25 = vadd.f32 %v4049_v28, %v2306_v2  ;;  %v3158_v30 = vpop.f32.mrb[94].mxu0 }
 0x397   : > { %v2335_v9 = vadd.f32 %v2315_v29, %v3590_v35  ;;  %v2318_v26 = vadd.f32 %v3158_v30, %v4049_v28  ;;  %v2309_v43 = vpop.f32.mrb[95].mxu0 }
 0x398   : > { %v2333_v20 = vadd.f32 %v2307_v25, %v3580_v31  ;;  %v2310_v3 = vadd.f32 %v4049_v28, %v2309_v43 }
 0x399   : > { %v2351_v39 = vmax.f32 %v2335_v9, 0.0  ;;  %v2336_v60 = vadd.f32 %v2318_v26, %v3593_v36 }
 0x39a   : > { %v2349_v50 = vmax.f32 %v2333_v20, 0.0  ;;  %v2334_v55 = vadd.f32 %v2310_v3, %v3583_v32 }
 0x39b   : > { %2367 = vst [vmem:[%s3515_s16 + $0x70] sm:$0xff] %v2351_v39  ;;  %v2352_v42 = vmax.f32 %v2336_v60, 0.0 }
 0x39c   : > { %2365 = vst [vmem:[%s3515_s16 + $0x60] sm:$0xff] %v2349_v50  ;;  %v2350_v1 = vmax.f32 %v2334_v55, 0.0 }
 0x39d   : > { %2368 = vst [vmem:[%s3515_s16 + $0x78] sm:$0xff] %v2352_v42 }
 0x39e   : > { %2366 = vst [vmem:[%s3515_s16 + $0x68] sm:$0xff] %v2350_v1 }
 0x39f PF: > { %s18_s9 = sadd.s32 1, %s3408_s9   ;;  %s4123_s27 = smov %s3400_s29 }
 0x3a0   : > { %p15_p10 = scmp.ge.s32.totalorder %s18_s9, 6   ;;  %s4124_s28 = smov %s3404_s30 }
 0x3a1   : > { %s4125_s29 = smov %s4128_s10  ;;  %s4126_s30 = smov %s4132_s11 }
 0x3a2   :  { %17 = sbr.rel (!%p15_p10) target bundleno = 3 (0x3), region = 98 }

</bundles_post_ra>
